<compile_context>
chip_gen: v5e
topology: v5e:2x2
jax: 0.10.0
libtpu: 0.0.40
codegen_flags: <defaults>
</compile_context>

<pallas_src>
import jax
import jax.numpy as jnp
from jax.experimental import pallas as pl
from jax.experimental.pallas import tpu as pltpu

_HP = jax.lax.Precision.HIGHEST


# ---------------------------------------------------------------------------
# Pallas recurrent kernel (both directions of one layer, time-blocked grid)
# ---------------------------------------------------------------------------

def _bilstm_recurrent_kernel(lens_ref, gx_ref, whh_ref, y_ref, h_scr, c_scr):
    """grid = (direction, time_block).

    lens_ref: (B, 1) int32   valid lengths
    gx_ref:   (T_BLK, B, 4H) precomputed x@W_ih + b for this direction / time block
              (backward direction is already per-sequence time-reversed)
    whh_ref:  (H, 4H)        recurrent weights for this direction (transposed)
    y_ref:    (T_BLK, B, H)  per-step hidden outputs (zeros past valid length)
    h_scr/c_scr: (B, H) f32  recurrent state, persists across time blocks
    """
    H = whh_ref.shape[0]
    t_blk = gx_ref.shape[0]

    @pl.when(pl.program_id(1) == 0)          # new direction -> reset state
    def _():
        h_scr[...] = jnp.zeros_like(h_scr)
        c_scr[...] = jnp.zeros_like(c_scr)

    whh = whh_ref[...]                                          # (H, 4H)
    lens = jnp.broadcast_to(lens_ref[...], h_scr.shape)         # (B, H), hoisted
    t0 = pl.program_id(1) * t_blk

    def step(i, carry):
        t = t0 + i
        h = h_scr[...]
        c = c_scr[...]
        gates = gx_ref[i] + jnp.dot(h, whh, preferred_element_type=jnp.float32)
        i_g = jax.nn.sigmoid(gates[:, 0:H])                     # PyTorch order i,f,g,o
        f_g = jax.nn.sigmoid(gates[:, H:2 * H])
        g_g = jnp.tanh(gates[:, 2 * H:3 * H])
        o_g = jax.nn.sigmoid(gates[:, 3 * H:4 * H])
        c_new = f_g * c + i_g * g_g
        h_new = o_g * jnp.tanh(c_new)
        mask = t < lens                                         # packed-seq semantics
        h_scr[...] = jnp.where(mask, h_new, h)
        c_scr[...] = jnp.where(mask, c_new, c)
        y_ref[i] = jnp.where(mask, h_new, 0.0)
        return carry

    jax.lax.fori_loop(0, t_blk, step, 0, unroll=True)


# ---------------------------------------------------------------------------
# Wrappers
# ---------------------------------------------------------------------------

def _bilstm_layer(x, wih, b, whh, lens2d, rev_idx_tm, eq, t_blk):
    """One bidirectional LSTM layer.

    x:   (B,T,Din) if eq=='btd,dg->tbg' else (T,B,Din)
    wih: (Din, 8H)  both directions' input weights, transposed & concatenated
    b:   (1, 8H)    combined biases (b_ih + b_hh), both directions
    whh: (2, H, 4H) recurrent weights per direction, transposed
    returns (T, B, 2H) time-major output.
    """
    T, B = rev_idx_tm.shape
    H = whh.shape[1]
    G = 4 * H

    # One large MXU-saturating matmul for both directions (hoisted out of the loop);
    # output is produced time-major, absorbing the layout change.
    gx_all = jnp.einsum(eq, x, wih, precision=_HP) + b           # (T, B, 8H)
    gx_f = gx_all[..., :G]
    gx_b = jnp.take_along_axis(gx_all[..., G:], rev_idx_tm[:, :, None], axis=0)
    gx = jnp.stack([gx_f, gx_b], axis=0)                         # (2, T, B, 4H)

    n_blk = pl.cdiv(T, t_blk)
    t_pad = n_blk * t_blk
    if t_pad != T:                                               # padded steps are masked out
        gx = jnp.pad(gx, ((0, 0), (0, t_pad - T), (0, 0), (0, 0)))

    y = pl.pallas_call(
        _bilstm_recurrent_kernel,
        out_shape=jax.ShapeDtypeStruct((2, t_pad, B, H), jnp.float32),
        grid=(2, n_blk),                                         # (direction, time block)
        in_specs=[
            pl.BlockSpec((B, 1), lambda d, t: (0, 0)),
            pl.BlockSpec((None, t_blk, B, G), lambda d, t: (d, t, 0, 0)),
            pl.BlockSpec((None, H, G), lambda d, t: (d, 0, 0)),
        ],
        out_specs=pl.BlockSpec((None, t_blk, B, H), lambda d, t: (d, t, 0, 0)),
        scratch_shapes=[pltpu.VMEM((B, H), jnp.float32),
                        pltpu.VMEM((B, H), jnp.float32)],
        compiler_params=pltpu.CompilerParams(
            dimension_semantics=("parallel", "arbitrary"),       # dirs -> cores on v7x
            vmem_limit_bytes=32 * 1024 * 1024),
    )(lens2d, gx, whh)

    y = y[:, :T]
    # un-reverse the backward direction; positions >= len stay zero.
    y_b = jnp.take_along_axis(y[1], rev_idx_tm[:, :, None], axis=0)
    return jnp.concatenate([y[0], y_b], axis=-1)                 # (T, B, 2H)


def lstm_encoder_forward(params, sents, sent_length, t_blk=4):
    """Equivalent of LSTMEncoder.forward(sents, sent_length)."""
    B, T, _ = sents.shape
    lengths = sent_length.astype(jnp.int32)
    lens2d = lengths[:, None]

    # per-sequence time reversal index (identity past valid length), time-major (T, B)
    t_idx = jnp.arange(T)[:, None]
    rev_idx_tm = jnp.where(t_idx < lengths[None, :], lengths[None, :] - 1 - t_idx, t_idx)

    x = sents
    eq = 'btd,dg->tbg'                       # first layer absorbs batch-first transpose
    for lp in params["layers"]:
        x = _bilstm_layer(x, lp["wih"], lp["b"], lp["whh"], lens2d, rev_idx_tm, eq, t_blk)
        eq = 'tbd,dg->tbg'

    # lstm_embedding = unpacked[arange(B), len - 1]  (x is time-major (T, B, 2H))
    last_idx = jnp.clip(lengths - 1, 0, T - 1)
    last = jnp.take_along_axis(x, last_idx[None, :, None], axis=0)[0]   # (B, 2H)

    # Final Linear: tiny matmul, left to XLA (fused with the gather / zero-fill).
    out = jnp.dot(last, params["fc_w"], precision=_HP) + params["fc_b"]
    return jnp.where(lengths[:, None] > 0, out, 0.0)            # F.pad of dropped rows


# ---------------------------------------------------------------------------
# Deterministic parameter init (same shapes / init scheme as nn.LSTM + nn.Linear)
# ---------------------------------------------------------------------------

def init_params(key, input_size, hidden_size, num_layers, output_size):
    H = hidden_size
    layers = []
    k = 1.0 / float(H) ** 0.5
    for layer in range(num_layers):
        in_dim = input_size if layer == 0 else 2 * H
        wih_dirs, whh_dirs, b_dirs = [], [], []
        for _ in range(2):  # forward / backward
            key, k1, k2, k3, k4 = jax.random.split(key, 5)
            wih = jax.random.uniform(k1, (4 * H, in_dim), jnp.float32, -k, k)
            whh = jax.random.uniform(k2, (4 * H, H), jnp.float32, -k, k)
            bih = jax.random.uniform(k3, (4 * H,), jnp.float32, -k, k)
            bhh = jax.random.uniform(k4, (4 * H,), jnp.float32, -k, k)
            wih_dirs.append(wih.T)                # (in_dim, 4H)
            whh_dirs.append(whh.T)                # (H, 4H)
            b_dirs.append(bih + bhh)
        layers.append({
            "wih": jnp.concatenate(wih_dirs, axis=1),   # (in_dim, 8H)
            "b":   jnp.concatenate(b_dirs)[None, :],    # (1, 8H)
            "whh": jnp.stack(whh_dirs, axis=0),         # (2, H, 4H)
        })
    kf = 1.0 / float(2 * H) ** 0.5
    key, kf1, kf2 = jax.random.split(key, 3)
    fc_w = jax.random.uniform(kf1, (2 * H, output_size), jnp.float32, -kf, kf)
    fc_b = jax.random.uniform(kf2, (1, output_size), jnp.float32, -kf, kf)
    return {"layers": layers, "fc_w": fc_w, "fc_b": fc_b}


# ---------------------------------------------------------------------------
# Pure-JAX reference (for correctness check)
# ---------------------------------------------------------------------------

def _ref_forward(params, sents, sent_length):
    B, T, _ = sents.shape
    lengths = sent_length.astype(jnp.int32)
    t_idx = jnp.arange(T)[None, :]
    rev_idx = jnp.where(t_idx < lengths[:, None], lengths[:, None] - 1 - t_idx, t_idx)

    def run_dir(x, wih, whh, b):
        H = whh.shape[0]

        def step(carry, inp):
            h, c = carry
            xt, t = inp
            gates = (jnp.dot(xt, wih, precision=_HP)
                     + jnp.dot(h, whh, precision=_HP) + b)
            i = jax.nn.sigmoid(gates[:, 0:H])
            f = jax.nn.sigmoid(gates[:, H:2 * H])
            g = jnp.tanh(gates[:, 2 * H:3 * H])
            o = jax.nn.sigmoid(gates[:, 3 * H:4 * H])
            c_new = f * c + i * g
            h_new = o * jnp.tanh(c_new)
            m = (t < lengths)[:, None]
            return ((jnp.where(m, h_new, h), jnp.where(m, c_new, c)),
                    jnp.where(m, h_new, 0.0))

        init = (jnp.zeros((B, H), jnp.float32), jnp.zeros((B, H), jnp.float32))
        _, ys = jax.lax.scan(step, init, (jnp.transpose(x, (1, 0, 2)), jnp.arange(T)))
        return jnp.transpose(ys, (1, 0, 2))

    x = sents
    for lp in params["layers"]:
        H = lp["whh"].shape[1]
        G = 4 * H
        outs = []
        for d in range(2):
            wih_d = lp["wih"][:, d * G:(d + 1) * G]
            b_d = lp["b"][:, d * G:(d + 1) * G]
            whh_d = lp["whh"][d]
            xin = x if d == 0 else jnp.take_along_axis(x, rev_idx[:, :, None], axis=1)
            yd = run_dir(xin, wih_d, whh_d, b_d)
            if d == 1:
                yd = jnp.take_along_axis(yd, rev_idx[:, :, None], axis=1)
            outs.append(yd)
        x = jnp.concatenate(outs, axis=-1)
    last_idx = jnp.clip(lengths - 1, 0, T - 1)
    last = jnp.take_along_axis(x, last_idx[:, None, None], axis=1)[:, 0, :]
    out = jnp.dot(last, params["fc_w"], precision=_HP) + params["fc_b"]
    return jnp.where((lengths > 0)[:, None], out, 0.0)


# ---------------------------------------------------------------------------

if __name__ == "__main__":
    B, T = 8, 12
    input_size, hidden_size, num_layers, output_size = 16, 128, 2, 8

    key = jax.random.PRNGKey(0)
    kp, kx = jax.random.split(key)
    params = init_params(kp, input_size, hidden_size, num_layers, output_size)
    sents = jax.random.normal(kx, (B, T, input_size), jnp.float32)
    sent_length = jnp.array([5, 12, 0, 3, 12, 1, 7, 9], jnp.int32)  # includes a zero length

    fwd = jax.jit(lstm_encoder_forward)
    out = jax.block_until_ready(fwd(params, sents, sent_length))

    ref = _ref_forward(params, sents, sent_length)
    assert out.shape == (B, output_size)
    assert jnp.allclose(out, ref, rtol=5e-4, atol=5e-4), "mismatch vs pure-JAX reference"
    assert jnp.all(out[2] == 0.0), "zero-length sequence row must be zero"

    print("KERNEL_OK")
</pallas_src>

<mosaic_0001>
module attributes {stable_mosaic.version = 11 : i64} {
  func.func @_bilstm_recurrent_kernel(%arg0: i32, %arg1: i32, %arg2: memref<8x1xi32, #tpu.memory_space<vmem>>, %arg3: memref<1x4x8x512xf32, #tpu.memory_space<vmem>>, %arg4: memref<1x128x512xf32, #tpu.memory_space<vmem>>, %arg5: memref<1x4x8x128xf32, #tpu.memory_space<vmem>>, %arg6: memref<8x128xf32, #tpu.memory_space<vmem>>, %arg7: memref<8x128xf32, #tpu.memory_space<vmem>>) attributes {dimension_semantics = [#tpu.dimension_semantics<parallel>, #tpu.dimension_semantics<arbitrary>], iteration_bounds = array<i64: 2, 3>, scalar_prefetch = 0 : i64, scratch_operands = 2 : i64, tpu.core_type = #tpu.core_type<tc>, window_params = [{pipeline_mode = #tpu.pipeline_mode<synchronous>, transform_indices = @transform_0, window_bounds = array<i64: 8, 1>}, {transform_indices = @transform_1, window_bounds = array<i64: 1, 4, 8, 512>}, {transform_indices = @transform_2, window_bounds = array<i64: 1, 128, 512>}, {transform_indices = @transform_3, window_bounds = array<i64: 1, 4, 8, 128>}]} {
    %c0_i32 = arith.constant 0 : i32
    %0 = arith.cmpi eq, %arg1, %c0_i32 : i32
    %1 = arith.extui %0 : i1 to i32
    %c0_i32_0 = arith.constant 0 : i32
    %2 = arith.cmpi ne, %1, %c0_i32_0 : i32
    scf.if %2 {
      %cst_82 = arith.constant 0.000000e+00 : f32
      %189 = vector.broadcast %cst_82 : f32 to vector<8x128xf32>
      %c0_83 = arith.constant 0 : index
      %c0_84 = arith.constant 0 : index
      %190 = vector.load %arg6[%c0_83, %c0_84] : memref<8x128xf32, #tpu.memory_space<vmem>>, vector<8x128xf32>
      tpu.vector_store %arg6[%c0_83, %c0_84], %189 {strides = array<i32>} : memref<8x128xf32, #tpu.memory_space<vmem>>, vector<8x128xf32>,
      %cst_85 = arith.constant 0.000000e+00 : f32
      %191 = vector.broadcast %cst_85 : f32 to vector<8x128xf32>
      %c0_86 = arith.constant 0 : index
      %c0_87 = arith.constant 0 : index
      %192 = vector.load %arg7[%c0_86, %c0_87] : memref<8x128xf32, #tpu.memory_space<vmem>>, vector<8x128xf32>
      tpu.vector_store %arg7[%c0_86, %c0_87], %191 {strides = array<i32>} : memref<8x128xf32, #tpu.memory_space<vmem>>, vector<8x128xf32>,
    } else {
    }
    %c0 = arith.constant 0 : index
    %c0_1 = arith.constant 0 : index
    %c0_2 = arith.constant 0 : index
    %3 = vector.load %arg4[%c0, %c0_1, %c0_2] : memref<1x128x512xf32, #tpu.memory_space<vmem>>, vector<1x128x512xf32>
    %4 = vector.shape_cast %3 : vector<1x128x512xf32> to vector<128x512xf32>
    %c0_3 = arith.constant 0 : index
    %c0_4 = arith.constant 0 : index
    %5 = vector.load %arg2[%c0_3, %c0_4] : memref<8x1xi32, #tpu.memory_space<vmem>>, vector<8x1xi32>
    %6 = vector.shape_cast %5 : vector<8x1xi32> to vector<8x1xi32>
    %7 = vector.broadcast %6 : vector<8x1xi32> to vector<8x128xi32>
    %c4_i32 = arith.constant 4 : i32
    %8 = arith.muli %arg1, %c4_i32 : i32
    %c0_i32_5 = arith.constant 0 : i32
    %9 = arith.addi %8, %c0_i32_5 : i32
    %c0_6 = arith.constant 0 : index
    %c0_7 = arith.constant 0 : index
    %10 = vector.load %arg6[%c0_6, %c0_7] : memref<8x128xf32, #tpu.memory_space<vmem>>, vector<8x128xf32>
    %c0_8 = arith.constant 0 : index
    %c0_9 = arith.constant 0 : index
    %11 = vector.load %arg7[%c0_8, %c0_9] : memref<8x128xf32, #tpu.memory_space<vmem>>, vector<8x128xf32>
    %c0_10 = arith.constant 0 : index
    %12 = arith.index_cast %c0_i32_5 : i32 to index
    %c0_11 = arith.constant 0 : index
    %c0_12 = arith.constant 0 : index
    %13 = vector.load %arg3[%c0_10, %12, %c0_11, %c0_12] : memref<1x4x8x512xf32, #tpu.memory_space<vmem>>, vector<1x1x8x512xf32>
    %14 = vector.shape_cast %13 : vector<1x1x8x512xf32> to vector<8x512xf32>
    %cst = arith.constant dense<0.000000e+00> : vector<8x512xf32>
    %15 = tpu.matmul %10, %4, %cst {dimension_numbers = #tpu.dot_dimension_numbers<[1], [0], [0], [1], [0, 0, 1, 1], [], []>} : vector<8x128xf32>, vector<128x512xf32>, vector<8x512xf32> -> vector<8x512xf32>
    %16 = arith.addf %14, %15 : vector<8x512xf32>
    %17 = vector.extract_strided_slice %16 {offsets = [0, 0], sizes = [8, 128], strides = [1, 1]} : vector<8x512xf32> to vector<8x128xf32>
    %18 = arith.negf %17 : vector<8x128xf32>
    %19 = math.exp %18 : vector<8x128xf32>
    %cst_13 = arith.constant 1.000000e+00 : f32
    %20 = vector.broadcast %cst_13 : f32 to vector<8x128xf32>
    %21 = arith.addf %20, %19 : vector<8x128xf32>
    %22 = arith.divf %20, %21 : vector<8x128xf32>
    %23 = vector.extract_strided_slice %16 {offsets = [0, 128], sizes = [8, 128], strides = [1, 1]} : vector<8x512xf32> to vector<8x128xf32>
    %24 = arith.negf %23 : vector<8x128xf32>
    %25 = math.exp %24 : vector<8x128xf32>
    %cst_14 = arith.constant 1.000000e+00 : f32
    %26 = vector.broadcast %cst_14 : f32 to vector<8x128xf32>
    %27 = arith.addf %26, %25 : vector<8x128xf32>
    %28 = arith.divf %26, %27 : vector<8x128xf32>
    %29 = vector.extract_strided_slice %16 {offsets = [0, 256], sizes = [8, 128], strides = [1, 1]} : vector<8x512xf32> to vector<8x128xf32>
    %30 = math.tanh %29 : vector<8x128xf32>
    %31 = vector.extract_strided_slice %16 {offsets = [0, 384], sizes = [8, 128], strides = [1, 1]} : vector<8x512xf32> to vector<8x128xf32>
    %32 = arith.negf %31 : vector<8x128xf32>
    %33 = math.exp %32 : vector<8x128xf32>
    %cst_15 = arith.constant 1.000000e+00 : f32
    %34 = vector.broadcast %cst_15 : f32 to vector<8x128xf32>
    %35 = arith.addf %34, %33 : vector<8x128xf32>
    %36 = arith.divf %34, %35 : vector<8x128xf32>
    %37 = arith.mulf %28, %11 : vector<8x128xf32>
    %38 = arith.mulf %22, %30 : vector<8x128xf32>
    %39 = arith.addf %37, %38 : vector<8x128xf32>
    %40 = math.tanh %39 : vector<8x128xf32>
    %41 = arith.mulf %36, %40 : vector<8x128xf32>
    %42 = vector.broadcast %9 : i32 to vector<8x128xi32>
    %43 = arith.cmpi slt, %42, %7 : vector<8x128xi32>
    %44 = arith.select %43, %41, %10 : vector<8x128xi1>, vector<8x128xf32>
    %c0_16 = arith.constant 0 : index
    %c0_17 = arith.constant 0 : index
    %45 = vector.load %arg6[%c0_16, %c0_17] : memref<8x128xf32, #tpu.memory_space<vmem>>, vector<8x128xf32>
    tpu.vector_store %arg6[%c0_16, %c0_17], %44 {strides = array<i32>} : memref<8x128xf32, #tpu.memory_space<vmem>>, vector<8x128xf32>,
    %46 = arith.select %43, %39, %11 : vector<8x128xi1>, vector<8x128xf32>
    %c0_18 = arith.constant 0 : index
    %c0_19 = arith.constant 0 : index
    %47 = vector.load %arg7[%c0_18, %c0_19] : memref<8x128xf32, #tpu.memory_space<vmem>>, vector<8x128xf32>
    tpu.vector_store %arg7[%c0_18, %c0_19], %46 {strides = array<i32>} : memref<8x128xf32, #tpu.memory_space<vmem>>, vector<8x128xf32>,
    %cst_20 = arith.constant 0.000000e+00 : f32
    %48 = vector.broadcast %cst_20 : f32 to vector<8x128xf32>
    %49 = arith.select %43, %41, %48 : vector<8x128xi1>, vector<8x128xf32>
    %c0_21 = arith.constant 0 : index
    %50 = arith.index_cast %c0_i32_5 : i32 to index
    %c0_22 = arith.constant 0 : index
    %c0_23 = arith.constant 0 : index
    %51 = vector.load %arg5[%c0_21, %50, %c0_22, %c0_23] : memref<1x4x8x128xf32, #tpu.memory_space<vmem>>, vector<1x1x8x128xf32>
    %52 = vector.shape_cast %51 : vector<1x1x8x128xf32> to vector<8x128xf32>
    %53 = vector.shape_cast %49 : vector<8x128xf32> to vector<1x1x8x128xf32>
    tpu.vector_store %arg5[%c0_21, %50, %c0_22, %c0_23], %53 {strides = array<i32>} : memref<1x4x8x128xf32, #tpu.memory_space<vmem>>, vector<1x1x8x128xf32>,
    %c1_i32 = arith.constant 1 : i32
    %54 = arith.addi %8, %c1_i32 : i32
    %c0_24 = arith.constant 0 : index
    %c0_25 = arith.constant 0 : index
    %55 = vector.load %arg6[%c0_24, %c0_25] : memref<8x128xf32, #tpu.memory_space<vmem>>, vector<8x128xf32>
    %c0_26 = arith.constant 0 : index
    %c0_27 = arith.constant 0 : index
    %56 = vector.load %arg7[%c0_26, %c0_27] : memref<8x128xf32, #tpu.memory_space<vmem>>, vector<8x128xf32>
    %c0_28 = arith.constant 0 : index
    %57 = arith.index_cast %c1_i32 : i32 to index
    %c0_29 = arith.constant 0 : index
    %c0_30 = arith.constant 0 : index
    %58 = vector.load %arg3[%c0_28, %57, %c0_29, %c0_30] : memref<1x4x8x512xf32, #tpu.memory_space<vmem>>, vector<1x1x8x512xf32>
    %59 = vector.shape_cast %58 : vector<1x1x8x512xf32> to vector<8x512xf32>
    %cst_31 = arith.constant dense<0.000000e+00> : vector<8x512xf32>
    %60 = tpu.matmul %55, %4, %cst_31 {dimension_numbers = #tpu.dot_dimension_numbers<[1], [0], [0], [1], [0, 0, 1, 1], [], []>} : vector<8x128xf32>, vector<128x512xf32>, vector<8x512xf32> -> vector<8x512xf32>
    %61 = arith.addf %59, %60 : vector<8x512xf32>
    %62 = vector.extract_strided_slice %61 {offsets = [0, 0], sizes = [8, 128], strides = [1, 1]} : vector<8x512xf32> to vector<8x128xf32>
    %63 = arith.negf %62 : vector<8x128xf32>
    %64 = math.exp %63 : vector<8x128xf32>
    %cst_32 = arith.constant 1.000000e+00 : f32
    %65 = vector.broadcast %cst_32 : f32 to vector<8x128xf32>
    %66 = arith.addf %65, %64 : vector<8x128xf32>
    %67 = arith.divf %65, %66 : vector<8x128xf32>
    %68 = vector.extract_strided_slice %61 {offsets = [0, 128], sizes = [8, 128], strides = [1, 1]} : vector<8x512xf32> to vector<8x128xf32>
    %69 = arith.negf %68 : vector<8x128xf32>
    %70 = math.exp %69 : vector<8x128xf32>
    %cst_33 = arith.constant 1.000000e+00 : f32
    %71 = vector.broadcast %cst_33 : f32 to vector<8x128xf32>
    %72 = arith.addf %71, %70 : vector<8x128xf32>
    %73 = arith.divf %71, %72 : vector<8x128xf32>
    %74 = vector.extract_strided_slice %61 {offsets = [0, 256], sizes = [8, 128], strides = [1, 1]} : vector<8x512xf32> to vector<8x128xf32>
    %75 = math.tanh %74 : vector<8x128xf32>
    %76 = vector.extract_strided_slice %61 {offsets = [0, 384], sizes = [8, 128], strides = [1, 1]} : vector<8x512xf32> to vector<8x128xf32>
    %77 = arith.negf %76 : vector<8x128xf32>
    %78 = math.exp %77 : vector<8x128xf32>
    %cst_34 = arith.constant 1.000000e+00 : f32
    %79 = vector.broadcast %cst_34 : f32 to vector<8x128xf32>
    %80 = arith.addf %79, %78 : vector<8x128xf32>
    %81 = arith.divf %79, %80 : vector<8x128xf32>
    %82 = arith.mulf %73, %56 : vector<8x128xf32>
    %83 = arith.mulf %67, %75 : vector<8x128xf32>
    %84 = arith.addf %82, %83 : vector<8x128xf32>
    %85 = math.tanh %84 : vector<8x128xf32>
    %86 = arith.mulf %81, %85 : vector<8x128xf32>
    %87 = vector.broadcast %54 : i32 to vector<8x128xi32>
    %88 = arith.cmpi slt, %87, %7 : vector<8x128xi32>
    %89 = arith.select %88, %86, %55 : vector<8x128xi1>, vector<8x128xf32>
    %c0_35 = arith.constant 0 : index
    %c0_36 = arith.constant 0 : index
    %90 = vector.load %arg6[%c0_35, %c0_36] : memref<8x128xf32, #tpu.memory_space<vmem>>, vector<8x128xf32>
    tpu.vector_store %arg6[%c0_35, %c0_36], %89 {strides = array<i32>} : memref<8x128xf32, #tpu.memory_space<vmem>>, vector<8x128xf32>,
    %91 = arith.select %88, %84, %56 : vector<8x128xi1>, vector<8x128xf32>
    %c0_37 = arith.constant 0 : index
    %c0_38 = arith.constant 0 : index
    %92 = vector.load %arg7[%c0_37, %c0_38] : memref<8x128xf32, #tpu.memory_space<vmem>>, vector<8x128xf32>
    tpu.vector_store %arg7[%c0_37, %c0_38], %91 {strides = array<i32>} : memref<8x128xf32, #tpu.memory_space<vmem>>, vector<8x128xf32>,
    %cst_39 = arith.constant 0.000000e+00 : f32
    %93 = vector.broadcast %cst_39 : f32 to vector<8x128xf32>
    %94 = arith.select %88, %86, %93 : vector<8x128xi1>, vector<8x128xf32>
    %c0_40 = arith.constant 0 : index
    %95 = arith.index_cast %c1_i32 : i32 to index
    %c0_41 = arith.constant 0 : index
    %c0_42 = arith.constant 0 : index
    %96 = vector.load %arg5[%c0_40, %95, %c0_41, %c0_42] : memref<1x4x8x128xf32, #tpu.memory_space<vmem>>, vector<1x1x8x128xf32>
    %97 = vector.shape_cast %96 : vector<1x1x8x128xf32> to vector<8x128xf32>
    %98 = vector.shape_cast %94 : vector<8x128xf32> to vector<1x1x8x128xf32>
    tpu.vector_store %arg5[%c0_40, %95, %c0_41, %c0_42], %98 {strides = array<i32>} : memref<1x4x8x128xf32, #tpu.memory_space<vmem>>, vector<1x1x8x128xf32>,
    %c2_i32 = arith.constant 2 : i32
    %99 = arith.addi %8, %c2_i32 : i32
    %c0_43 = arith.constant 0 : index
    %c0_44 = arith.constant 0 : index
    %100 = vector.load %arg6[%c0_43, %c0_44] : memref<8x128xf32, #tpu.memory_space<vmem>>, vector<8x128xf32>
    %c0_45 = arith.constant 0 : index
    %c0_46 = arith.constant 0 : index
    %101 = vector.load %arg7[%c0_45, %c0_46] : memref<8x128xf32, #tpu.memory_space<vmem>>, vector<8x128xf32>
    %c0_47 = arith.constant 0 : index
    %102 = arith.index_cast %c2_i32 : i32 to index
    %c0_48 = arith.constant 0 : index
    %c0_49 = arith.constant 0 : index
    %103 = vector.load %arg3[%c0_47, %102, %c0_48, %c0_49] : memref<1x4x8x512xf32, #tpu.memory_space<vmem>>, vector<1x1x8x512xf32>
    %104 = vector.shape_cast %103 : vector<1x1x8x512xf32> to vector<8x512xf32>
    %cst_50 = arith.constant dense<0.000000e+00> : vector<8x512xf32>
    %105 = tpu.matmul %100, %4, %cst_50 {dimension_numbers = #tpu.dot_dimension_numbers<[1], [0], [0], [1], [0, 0, 1, 1], [], []>} : vector<8x128xf32>, vector<128x512xf32>, vector<8x512xf32> -> vector<8x512xf32>
    %106 = arith.addf %104, %105 : vector<8x512xf32>
    %107 = vector.extract_strided_slice %106 {offsets = [0, 0], sizes = [8, 128], strides = [1, 1]} : vector<8x512xf32> to vector<8x128xf32>
    %108 = arith.negf %107 : vector<8x128xf32>
    %109 = math.exp %108 : vector<8x128xf32>
    %cst_51 = arith.constant 1.000000e+00 : f32
    %110 = vector.broadcast %cst_51 : f32 to vector<8x128xf32>
    %111 = arith.addf %110, %109 : vector<8x128xf32>
    %112 = arith.divf %110, %111 : vector<8x128xf32>
    %113 = vector.extract_strided_slice %106 {offsets = [0, 128], sizes = [8, 128], strides = [1, 1]} : vector<8x512xf32> to vector<8x128xf32>
    %114 = arith.negf %113 : vector<8x128xf32>
    %115 = math.exp %114 : vector<8x128xf32>
    %cst_52 = arith.constant 1.000000e+00 : f32
    %116 = vector.broadcast %cst_52 : f32 to vector<8x128xf32>
    %117 = arith.addf %116, %115 : vector<8x128xf32>
    %118 = arith.divf %116, %117 : vector<8x128xf32>
    %119 = vector.extract_strided_slice %106 {offsets = [0, 256], sizes = [8, 128], strides = [1, 1]} : vector<8x512xf32> to vector<8x128xf32>
    %120 = math.tanh %119 : vector<8x128xf32>
    %121 = vector.extract_strided_slice %106 {offsets = [0, 384], sizes = [8, 128], strides = [1, 1]} : vector<8x512xf32> to vector<8x128xf32>
    %122 = arith.negf %121 : vector<8x128xf32>
    %123 = math.exp %122 : vector<8x128xf32>
    %cst_53 = arith.constant 1.000000e+00 : f32
    %124 = vector.broadcast %cst_53 : f32 to vector<8x128xf32>
    %125 = arith.addf %124, %123 : vector<8x128xf32>
    %126 = arith.divf %124, %125 : vector<8x128xf32>
    %127 = arith.mulf %118, %101 : vector<8x128xf32>
    %128 = arith.mulf %112, %120 : vector<8x128xf32>
    %129 = arith.addf %127, %128 : vector<8x128xf32>
    %130 = math.tanh %129 : vector<8x128xf32>
    %131 = arith.mulf %126, %130 : vector<8x128xf32>
    %132 = vector.broadcast %99 : i32 to vector<8x128xi32>
    %133 = arith.cmpi slt, %132, %7 : vector<8x128xi32>
    %134 = arith.select %133, %131, %100 : vector<8x128xi1>, vector<8x128xf32>
    %c0_54 = arith.constant 0 : index
    %c0_55 = arith.constant 0 : index
    %135 = vector.load %arg6[%c0_54, %c0_55] : memref<8x128xf32, #tpu.memory_space<vmem>>, vector<8x128xf32>
    tpu.vector_store %arg6[%c0_54, %c0_55], %134 {strides = array<i32>} : memref<8x128xf32, #tpu.memory_space<vmem>>, vector<8x128xf32>,
    %136 = arith.select %133, %129, %101 : vector<8x128xi1>, vector<8x128xf32>
    %c0_56 = arith.constant 0 : index
    %c0_57 = arith.constant 0 : index
    %137 = vector.load %arg7[%c0_56, %c0_57] : memref<8x128xf32, #tpu.memory_space<vmem>>, vector<8x128xf32>
    tpu.vector_store %arg7[%c0_56, %c0_57], %136 {strides = array<i32>} : memref<8x128xf32, #tpu.memory_space<vmem>>, vector<8x128xf32>,
    %cst_58 = arith.constant 0.000000e+00 : f32
    %138 = vector.broadcast %cst_58 : f32 to vector<8x128xf32>
    %139 = arith.select %133, %131, %138 : vector<8x128xi1>, vector<8x128xf32>
    %c0_59 = arith.constant 0 : index
    %140 = arith.index_cast %c2_i32 : i32 to index
    %c0_60 = arith.constant 0 : index
    %c0_61 = arith.constant 0 : index
    %141 = vector.load %arg5[%c0_59, %140, %c0_60, %c0_61] : memref<1x4x8x128xf32, #tpu.memory_space<vmem>>, vector<1x1x8x128xf32>
    %142 = vector.shape_cast %141 : vector<1x1x8x128xf32> to vector<8x128xf32>
    %143 = vector.shape_cast %139 : vector<8x128xf32> to vector<1x1x8x128xf32>
    tpu.vector_store %arg5[%c0_59, %140, %c0_60, %c0_61], %143 {strides = array<i32>} : memref<1x4x8x128xf32, #tpu.memory_space<vmem>>, vector<1x1x8x128xf32>,
    %c3_i32 = arith.constant 3 : i32
    %144 = arith.addi %8, %c3_i32 : i32
    %c0_62 = arith.constant 0 : index
    %c0_63 = arith.constant 0 : index
    %145 = vector.load %arg6[%c0_62, %c0_63] : memref<8x128xf32, #tpu.memory_space<vmem>>, vector<8x128xf32>
    %c0_64 = arith.constant 0 : index
    %c0_65 = arith.constant 0 : index
    %146 = vector.load %arg7[%c0_64, %c0_65] : memref<8x128xf32, #tpu.memory_space<vmem>>, vector<8x128xf32>
    %c0_66 = arith.constant 0 : index
    %147 = arith.index_cast %c3_i32 : i32 to index
    %c0_67 = arith.constant 0 : index
    %c0_68 = arith.constant 0 : index
    %148 = vector.load %arg3[%c0_66, %147, %c0_67, %c0_68] : memref<1x4x8x512xf32, #tpu.memory_space<vmem>>, vector<1x1x8x512xf32>
    %149 = vector.shape_cast %148 : vector<1x1x8x512xf32> to vector<8x512xf32>
    %cst_69 = arith.constant dense<0.000000e+00> : vector<8x512xf32>
    %150 = tpu.matmul %145, %4, %cst_69 {dimension_numbers = #tpu.dot_dimension_numbers<[1], [0], [0], [1], [0, 0, 1, 1], [], []>} : vector<8x128xf32>, vector<128x512xf32>, vector<8x512xf32> -> vector<8x512xf32>
    %151 = arith.addf %149, %150 : vector<8x512xf32>
    %152 = vector.extract_strided_slice %151 {offsets = [0, 0], sizes = [8, 128], strides = [1, 1]} : vector<8x512xf32> to vector<8x128xf32>
    %153 = arith.negf %152 : vector<8x128xf32>
    %154 = math.exp %153 : vector<8x128xf32>
    %cst_70 = arith.constant 1.000000e+00 : f32
    %155 = vector.broadcast %cst_70 : f32 to vector<8x128xf32>
    %156 = arith.addf %155, %154 : vector<8x128xf32>
    %157 = arith.divf %155, %156 : vector<8x128xf32>
    %158 = vector.extract_strided_slice %151 {offsets = [0, 128], sizes = [8, 128], strides = [1, 1]} : vector<8x512xf32> to vector<8x128xf32>
    %159 = arith.negf %158 : vector<8x128xf32>
    %160 = math.exp %159 : vector<8x128xf32>
    %cst_71 = arith.constant 1.000000e+00 : f32
    %161 = vector.broadcast %cst_71 : f32 to vector<8x128xf32>
    %162 = arith.addf %161, %160 : vector<8x128xf32>
    %163 = arith.divf %161, %162 : vector<8x128xf32>
    %164 = vector.extract_strided_slice %151 {offsets = [0, 256], sizes = [8, 128], strides = [1, 1]} : vector<8x512xf32> to vector<8x128xf32>
    %165 = math.tanh %164 : vector<8x128xf32>
    %166 = vector.extract_strided_slice %151 {offsets = [0, 384], sizes = [8, 128], strides = [1, 1]} : vector<8x512xf32> to vector<8x128xf32>
    %167 = arith.negf %166 : vector<8x128xf32>
    %168 = math.exp %167 : vector<8x128xf32>
    %cst_72 = arith.constant 1.000000e+00 : f32
    %169 = vector.broadcast %cst_72 : f32 to vector<8x128xf32>
    %170 = arith.addf %169, %168 : vector<8x128xf32>
    %171 = arith.divf %169, %170 : vector<8x128xf32>
    %172 = arith.mulf %163, %146 : vector<8x128xf32>
    %173 = arith.mulf %157, %165 : vector<8x128xf32>
    %174 = arith.addf %172, %173 : vector<8x128xf32>
    %175 = math.tanh %174 : vector<8x128xf32>
    %176 = arith.mulf %171, %175 : vector<8x128xf32>
    %177 = vector.broadcast %144 : i32 to vector<8x128xi32>
    %178 = arith.cmpi slt, %177, %7 : vector<8x128xi32>
    %179 = arith.select %178, %176, %145 : vector<8x128xi1>, vector<8x128xf32>
    %c0_73 = arith.constant 0 : index
    %c0_74 = arith.constant 0 : index
    %180 = vector.load %arg6[%c0_73, %c0_74] : memref<8x128xf32, #tpu.memory_space<vmem>>, vector<8x128xf32>
    tpu.vector_store %arg6[%c0_73, %c0_74], %179 {strides = array<i32>} : memref<8x128xf32, #tpu.memory_space<vmem>>, vector<8x128xf32>,
    %181 = arith.select %178, %174, %146 : vector<8x128xi1>, vector<8x128xf32>
    %c0_75 = arith.constant 0 : index
    %c0_76 = arith.constant 0 : index
    %182 = vector.load %arg7[%c0_75, %c0_76] : memref<8x128xf32, #tpu.memory_space<vmem>>, vector<8x128xf32>
    tpu.vector_store %arg7[%c0_75, %c0_76], %181 {strides = array<i32>} : memref<8x128xf32, #tpu.memory_space<vmem>>, vector<8x128xf32>,
    %cst_77 = arith.constant 0.000000e+00 : f32
    %183 = vector.broadcast %cst_77 : f32 to vector<8x128xf32>
    %184 = arith.select %178, %176, %183 : vector<8x128xi1>, vector<8x128xf32>
    %c0_78 = arith.constant 0 : index
    %185 = arith.index_cast %c3_i32 : i32 to index
    %c0_79 = arith.constant 0 : index
    %c0_80 = arith.constant 0 : index
    %186 = vector.load %arg5[%c0_78, %185, %c0_79, %c0_80] : memref<1x4x8x128xf32, #tpu.memory_space<vmem>>, vector<1x1x8x128xf32>
    %187 = vector.shape_cast %186 : vector<1x1x8x128xf32> to vector<8x128xf32>
    %188 = vector.shape_cast %184 : vector<8x128xf32> to vector<1x1x8x128xf32>
    tpu.vector_store %arg5[%c0_78, %185, %c0_79, %c0_80], %188 {strides = array<i32>} : memref<1x4x8x128xf32, #tpu.memory_space<vmem>>, vector<1x1x8x128xf32>,
    %c4_i32_81 = arith.constant 4 : i32
    return
  }
  func.func @transform_0(%arg0: i32, %arg1: i32) -> (i32, i32) {
    %c0_i32 = arith.constant 0 : i32
    %c0_i32_0 = arith.constant 0 : i32
    %c0_i32_1 = arith.constant 0 : i32
    return %c0_i32, %c0_i32_0 : i32, i32
  }
  func.func @transform_1(%arg0: i32, %arg1: i32) -> (i32, i32, i32, i32) {
    %c0_i32 = arith.constant 0 : i32
    %c0_i32_0 = arith.constant 0 : i32
    %c0_i32_1 = arith.constant 0 : i32
    return %arg0, %arg1, %c0_i32, %c0_i32_0 : i32, i32, i32, i32
  }
  func.func @transform_2(%arg0: i32, %arg1: i32) -> (i32, i32, i32) {
    %c0_i32 = arith.constant 0 : i32
    %c0_i32_0 = arith.constant 0 : i32
    %c0_i32_1 = arith.constant 0 : i32
    return %arg0, %c0_i32, %c0_i32_0 : i32, i32, i32
  }
  func.func @transform_3(%arg0: i32, %arg1: i32) -> (i32, i32, i32, i32) {
    %c0_i32 = arith.constant 0 : i32
    %c0_i32_0 = arith.constant 0 : i32
    %c0_i32_1 = arith.constant 0 : i32
    return %arg0, %arg1, %c0_i32, %c0_i32_0 : i32, i32, i32, i32
  }
}

</mosaic_0001>

<bundles_post_ra>
// kernel: lstm_encoder_forward.2
= control target key start
LH: loop header
LB: loop body
LE: loop exit
PB: predicated region body
PF: predicated region fallthrough
CT: control target
= control target key end

     0   :  { %s1281_s12 = smov 0   ;;  %s1283_s13 = smov 0   ;;  %s1899_s0 = inlined_call_operand.vmem [shape: s32[8,1], index: 0, kind: input, shape index: {}]   ;;  %s1900_s1 = inlined_call_operand.vmem [shape: f32[2,12,8,512], index: 1, kind: input, shape index: {}]   ;;  %s1901_s2 = inlined_call_operand.vmem [shape: f32[2,128,512], index: 2, kind: input, shape index: {}]   ;;  %s1902_s3 = inlined_call_operand.vmem [shape: f32[2,12,8,128], index: 3, kind: output, shape index: {}]  }
   0x1   :  { %s1285_s14 = smov 0   ;;  %s1287_s15 = smov 0  }
   0x2   :  { %s1289_s16 = smov 0  }
   0x3 LB: > { %s22_s17 = sadd.s32 1, %s1249_s14  ;;  %s25_s18 = sadd.s32 1, %s1253_s15  ;;  %s1257_s16 = sphi %s1289_s16, %s13_s16   ;;  %s1253_s15 = sphi %s1287_s15, %s1995_s15   ;;  %s1249_s14 = sphi %s1285_s14, %s1994_s14   ;;  %s1245_s13 = sphi %s1283_s13, %s1993_s13   ;;  %s1241_s12 = sphi %s1281_s12, %s1992_s12  }
   0x4   : > { %p23_p0 = scmp.ge.s32.totalorder %s22_s17, 3  ;;  %p1070_p1 = scmp.ge.s32.totalorder %s1257_s16, 1 }
   0x5   : > { %p169_p2 = scmp.lt.s32.totalorder %s1257_s16, 7 }
   0x6   : > { %s1997_s17 = smov (%p23_p0, %s22_s17), 0  ;;  %s1999_s18 = smov (!%p23_p0, %s25_s18), %s1253_s15 }
   0x7   : > { %p170_p3 = pnand %p1070_p1, %p169_p2  ;;  %p27_p4 = scmp.ge.s32.totalorder %s1999_s18, 2 }
   0x9   : > { %s2001_s18 = smov (%p27_p4, %s1999_s18), 0  ;;  %173 = sbr.rel (%p170_p3) target bundleno = 747 (0x2eb), region = 32 }
   0xe   : > { %s1314_s19 = sshll.u32 %s1241_s12, 2  ;;  %p208_p5 = scmp.lt.s32.totalorder %s1245_s13, 1 }
   0xf   : > { %p210_p6 = scmp.lt.s32.totalorder %s1314_s19, 11  ;;  %p1078_p7 = scmp.ne.s32.totalorder %s1241_s12, 0 }
  0x10   : > { %s2003_s13 = smov (!%p208_p5, %s1245_s13), 1 }
  0x11   : > { %s211_s20 = scalar_select %p210_p6, %s1314_s19, 11 }
  0x12   : > { %s1110_s21 = smul.u32 48, %s2003_s13  ;;  %s1109_s22 = sshll.u32 %s2003_s13, 9 }
  0x13   : > { %s1072_s23 = sshll.u32 %s211_s20, 2  ;;  %s1321_s26 = scalar_lea.vmem %s1901_s2, %s1109_s22 }
  0x14   : > { %s214_s27 = sadd.s32 %s1110_s21, %s1072_s23  ;;  %s1111_s28 = smul.u32 12, %s2003_s13 }
  0x15   : > { %s1073_s29 = sshll.u32 %s214_s27, 3  ;;  %236 = sbr.rel (%p1078_p7) target bundleno = 29 (0x1d), region = 36 }
  0x16   : > { %s1326_s5 = scalar_lea.vmem %s1900_s1, %s1073_s29  ;;  %s229_s6 = sadd.s32 %s1111_s28, %s211_s20 }
  0x17   : > { %s1077_s7 = sshll.u32 %s229_s6, 3 }
  0x18   : > { %s1331_s10 = scalar_lea.vmem %s1902_s3, %s1077_s7 }
  0x1a   : > { %v1259_v0 = vmov 0.0  }
  0x1b   : > { %237 = vst [vmem:[#allocation2] sm:$0xff] %v1259_v0 }
  0x1c   : > { %238 = vst [vmem:[#allocation3] sm:$0xff] %v1259_v0 }
  0x1d PF: > { %v1335_v1 = vld [vmem:[%s1321_s26 + $0x1e0] sm:$0xff]  ;;  %v1338_v2 = vld [vmem:[%s1321_s26 + $0x1e8] sm:$0xff]  ;;  %v1341_v3 = vld [vmem:[%s1321_s26 + $0x1f8] sm:$0xff]  ;;  %v1260_v0 = vmov 0   ;;  %s469_s13 = sadd.s32 1, %s1314_s19  ;;  %s633_s20 = sadd.s32 2, %s1314_s19 }
  0x1e   : > { %314 = vmatpush.msra.mxu0 %v1335_v1  ;;  %334 = vmatpush.msra.mxu1 %v1338_v2  ;;  %v1346_v4 = vld [vmem:[%s1321_s26 + $0x1c0] sm:$0xff]  ;;  %v1349_v5 = vld [vmem:[%s1321_s26 + $0x1c8] sm:$0xff]  ;;  %v1352_v6 = vld [vmem:[%s1321_s26 + $0x1d8] sm:$0xff]  ;;  %s797_s21 = sadd.s32 3, %s1314_s19 }
  0x1f   : > { %374 = vmatpush.msra.mxu3 %v1341_v3  ;;  %v1356_v7 = vld [vmem:[%s1321_s26 + $0x1a0] sm:$0xff]  ;;  %v1359_v8 = vld [vmem:[%s1321_s26 + $0x1a8] sm:$0xff]  ;;  %v1364_v9 = vld [vmem:[%s1321_s26 + $0x1b8] sm:$0xff]  ;;  %1154 = vset.pattern.permute.xlu0 %v1260_v0 }
  0x20   : > { %315 = vmatpush.msra.mxu0 %v1346_v4  ;;  %335 = vmatpush.msra.mxu1 %v1349_v5  ;;  %v1368_v10 = vld [vmem:[%s1321_s26 + $0x180] sm:$0xff]  ;;  %v1371_v11 = vld [vmem:[%s1321_s26 + $0x188] sm:$0xff]  ;;  %v1376_v12 = vld [vmem:[%s1321_s26 + $0x198] sm:$0xff] }
  0x21   : > { %375 = vmatpush.msra.mxu3 %v1352_v6  ;;  %v1380_v13 = vld [vmem:[%s1321_s26 + $0x160] sm:$0xff]  ;;  %v1383_v14 = vld [vmem:[%s1321_s26 + $0x168] sm:$0xff]  ;;  %v1388_v15 = vld [vmem:[%s1321_s26 + $0x178] sm:$0xff] }
  0x22   : > { %316 = vmatpush.msra.mxu0 %v1356_v7  ;;  %336 = vmatpush.msra.mxu1 %v1359_v8  ;;  %v1392_v16 = vld [vmem:[%s1321_s26 + $0x140] sm:$0xff]  ;;  %v1395_v17 = vld [vmem:[%s1321_s26 + $0x148] sm:$0xff]  ;;  %v1398_v18 = vld [vmem:[%s1321_s26 + $0x1f0] sm:$0xff] }
  0x23   : > { %376 = vmatpush.msra.mxu3 %v1364_v9  ;;  %v1403_v19 = vld [vmem:[%s1321_s26 + $0x158] sm:$0xff]  ;;  %v1406_v20 = vld [vmem:[%s1321_s26 + $0x1d0] sm:$0xff]  ;;  %v1410_v21 = vld [vmem:[%s1321_s26 + $0x120] sm:$0xff]  ;;  %354 = vmatpush.msra.mxu2 %v1398_v18 }
  0x24   : > { %317 = vmatpush.msra.mxu0 %v1368_v10  ;;  %337 = vmatpush.msra.mxu1 %v1371_v11  ;;  %v1413_v22 = vld [vmem:[%s1321_s26 + $0x128] sm:$0xff]  ;;  %v1419_v23 = vld [vmem:[%s1321_s26 + $0x138] sm:$0xff]  ;;  %v1422_v24 = vld [vmem:[%s1321_s26 + $0x1b0] sm:$0xff] }
  0x25   : > { %377 = vmatpush.msra.mxu3 %v1376_v12  ;;  %v1426_v25 = vld [vmem:[%s1321_s26 + $0x100] sm:$0xff]  ;;  %v1429_v26 = vld [vmem:[%s1321_s26 + $0x108] sm:$0xff]  ;;  %355 = vmatpush.msra.mxu2 %v1406_v20  ;;  %v1435_v27 = vld [vmem:[%s1321_s26 + $0x118] sm:$0xff] }
  0x26   : > { %318 = vmatpush.msra.mxu0 %v1380_v13  ;;  %338 = vmatpush.msra.mxu1 %v1383_v14  ;;  %v1438_v28 = vld [vmem:[%s1321_s26 + $0x190] sm:$0xff]  ;;  %v1442_v29 = vld [vmem:[%s1321_s26 + $0xe0] sm:$0xff]  ;;  %v1445_v30 = vld [vmem:[%s1321_s26 + $0xe8] sm:$0xff] }
  0x27   : > { %378 = vmatpush.msra.mxu3 %v1388_v15  ;;  %356 = vmatpush.msra.mxu2 %v1422_v24  ;;  %v1451_v31 = vld [vmem:[%s1321_s26 + $0xf8] sm:$0xff]  ;;  %v1454_v32 = vld [vmem:[%s1321_s26 + $0x170] sm:$0xff]  ;;  %v1458_v33 = vld [vmem:[%s1321_s26 + $0xc0] sm:$0xff] }
  0x28   : > { %319 = vmatpush.msra.mxu0 %v1392_v16  ;;  %339 = vmatpush.msra.mxu1 %v1395_v17  ;;  %v1461_v34 = vld [vmem:[%s1321_s26 + $0xc8] sm:$0xff]  ;;  %v1467_v35 = vld [vmem:[%s1321_s26 + $0xd8] sm:$0xff]  ;;  %v1470_v36 = vld [vmem:[%s1321_s26 + $0x150] sm:$0xff] }
  0x29   : > { %379 = vmatpush.msra.mxu3 %v1403_v19  ;;  %357 = vmatpush.msra.mxu2 %v1438_v28  ;;  %1934 = vst [vmem:[#allocation4_spill] sm:$0xff] %v1467_v35  ;;  %v1474_v37 = vld [vmem:[%s1321_s26 + $0xa0] sm:$0xff]  ;;  %v1477_v38 = vld [vmem:[%s1321_s26 + $0xa8] sm:$0xff]  ;;  %v1483_v39 = vld [vmem:[%s1321_s26 + $0xb8] sm:$0xff] }
  0x2a   : > { %320 = vmatpush.msra.mxu0 %v1410_v21  ;;  %340 = vmatpush.msra.mxu1 %v1413_v22  ;;  %1935 = vst [vmem:[#allocation5_spill] sm:$0xff] %v1474_v37  ;;  %v1486_v40 = vld [vmem:[%s1321_s26 + $0x130] sm:$0xff]  ;;  %v1490_v41 = vld [vmem:[%s1321_s26 + $0x80] sm:$0xff]  ;;  %v1493_v42 = vld [vmem:[%s1321_s26 + $0x88] sm:$0xff] }
  0x2b   : > { %380 = vmatpush.msra.mxu3 %v1419_v23  ;;  %1936 = vst [vmem:[#allocation6_spill] sm:$0xff] %v1477_v38  ;;  %358 = vmatpush.msra.mxu2 %v1454_v32  ;;  %v1499_v43 = vld [vmem:[%s1321_s26 + $0x98] sm:$0xff]  ;;  %v1502_v44 = vld [vmem:[%s1321_s26 + $0x110] sm:$0xff]  ;;  %v1506_v45 = vld [vmem:[%s1321_s26 + $0x60] sm:$0xff] }
  0x2c   : > { %321 = vmatpush.msra.mxu0 %v1426_v25  ;;  %341 = vmatpush.msra.mxu1 %v1429_v26  ;;  %1937 = vst [vmem:[#allocation7_spill] sm:$0xff] %v1483_v39  ;;  %v1509_v46 = vld [vmem:[%s1321_s26 + $0x68] sm:$0xff]  ;;  %v1515_v47 = vld [vmem:[%s1321_s26 + $0x78] sm:$0xff]  ;;  %v1518_v48 = vld [vmem:[%s1321_s26 + $0xf0] sm:$0xff] }
  0x2d   : > { %381 = vmatpush.msra.mxu3 %v1435_v27  ;;  %1938 = vst [vmem:[#allocation8_spill] sm:$0xff] %v1490_v41  ;;  %359 = vmatpush.msra.mxu2 %v1470_v36  ;;  %v1522_v49 = vld [vmem:[%s1321_s26 + $0x40] sm:$0xff]  ;;  %v1525_v50 = vld [vmem:[%s1321_s26 + $0x48] sm:$0xff]  ;;  %v1531_v51 = vld [vmem:[%s1321_s26 + $0x58] sm:$0xff] }
  0x2e   : > { %322 = vmatpush.msra.mxu0 %v1442_v29  ;;  %342 = vmatpush.msra.mxu1 %v1445_v30  ;;  %1939 = vst [vmem:[#allocation9_spill] sm:$0xff] %v1493_v42  ;;  %v1534_v52 = vld [vmem:[%s1321_s26 + $0xd0] sm:$0xff]  ;;  %v1538_v53 = vld [vmem:[%s1321_s26 + $0x20] sm:$0xff]  ;;  %v1541_v54 = vld [vmem:[%s1321_s26 + $0x28] sm:$0xff] }
  0x2f   : > { %382 = vmatpush.msra.mxu3 %v1451_v31  ;;  %1940 = vst [vmem:[#allocation10_spill] sm:$0xff] %v1499_v43  ;;  %360 = vmatpush.msra.mxu2 %v1486_v40  ;;  %v1547_v55 = vld [vmem:[%s1321_s26 + $0x38] sm:$0xff]  ;;  %v1550_v56 = vld [vmem:[%s1321_s26 + $0xb0] sm:$0xff]  ;;  %v1554_v57 = vld [vmem:[%s1321_s26] sm:$0xff] }
  0x30   : > { %323 = vmatpush.msra.mxu0 %v1458_v33  ;;  %343 = vmatpush.msra.mxu1 %v1461_v34  ;;  %1941 = vst [vmem:[#allocation11_spill] sm:$0xff] %v1506_v45  ;;  %v1557_v58 = vld [vmem:[%s1321_s26 + $0x8] sm:$0xff]  ;;  %v1563_v59 = vld [vmem:[%s1321_s26 + $0x18] sm:$0xff]  ;;  %v1565_v60 = vld [vmem:[#allocation2] sm:$0xff] }
  0x31   : > { %383 = vmatpush.msra.mxu3 %v1467_v35  ;;  %1942 = vst [vmem:[#allocation12_spill] sm:$0xff] %v1509_v46  ;;  %361 = vmatpush.msra.mxu2 %v1502_v44  ;;  %v1572_v61 = vld [vmem:[%s1321_s26 + $0x90] sm:$0xff]  ;;  %v303_v62 = vld [vmem:[%s1899_s0] sm:$0xff] }
  0x32   : > { %324 = vmatpush.msra.mxu0 %v1474_v37  ;;  %344 = vmatpush.msra.mxu1 %v1477_v38  ;;  %1943 = vst [vmem:[#allocation13_spill] sm:$0xff] %v1515_v47  ;;  %v1582_v63 = vld [vmem:[%s1321_s26 + $0x70] sm:$0xff] }
  0x33   : > { %384 = vmatpush.msra.mxu3 %v1483_v39  ;;  %1944 = vst [vmem:[#allocation14_spill] sm:$0xff] %v1522_v49  ;;  %362 = vmatpush.msra.mxu2 %v1518_v48  ;;  %v1599_v0 = vld [vmem:[%s1321_s26 + $0x10] sm:$0xff] }
  0x34   : > { %325 = vmatpush.msra.mxu0 %v1490_v41  ;;  %345 = vmatpush.msra.mxu1 %v1493_v42  ;;  %1945 = vst [vmem:[#allocation15_spill] sm:$0xff] %v1525_v50 }
  0x35   : > { %385 = vmatpush.msra.mxu3 %v1499_v43  ;;  %1946 = vst [vmem:[#allocation16_spill] sm:$0xff] %v1531_v51  ;;  %363 = vmatpush.msra.mxu2 %v1534_v52 }
  0x36   : > { %326 = vmatpush.msra.mxu0 %v1506_v45  ;;  %346 = vmatpush.msra.mxu1 %v1509_v46  ;;  %1947 = vst [vmem:[#allocation17_spill] sm:$0xff] %v1534_v52 }
  0x37   : > { %386 = vmatpush.msra.mxu3 %v1515_v47  ;;  %1948 = vst [vmem:[#allocation18_spill] sm:$0xff] %v1538_v53  ;;  %364 = vmatpush.msra.mxu2 %v1550_v56 }
  0x38   : > { %1949 = vst [vmem:[#allocation19_spill] sm:$0xff] %v1541_v54  ;;  %327 = vmatpush.msra.mxu0 %v1522_v49  ;;  %347 = vmatpush.msra.mxu1 %v1525_v50 }
  0x39   : > { %1950 = vst [vmem:[#allocation20_spill] sm:$0xff] %v1547_v55  ;;  %387 = vmatpush.msra.mxu3 %v1531_v51  ;;  %365 = vmatpush.msra.mxu2 %v1572_v61 }
  0x3a   : > { %1951 = vst [vmem:[#allocation21_spill] sm:$0xff] %v1550_v56  ;;  %328 = vmatpush.msra.mxu0 %v1538_v53  ;;  %348 = vmatpush.msra.mxu1 %v1541_v54 }
  0x3b   : > { %1952 = vst [vmem:[#allocation22_spill] sm:$0xff] %v1554_v57  ;;  %388 = vmatpush.msra.mxu3 %v1547_v55  ;;  %305 = vperm.xlu0 %1154, %v303_v62  }
  0x3c   : > { %1953 = vst [vmem:[#allocation23_spill] sm:$0xff] %v1557_v58  ;;  %329 = vmatpush.msra.mxu0 %v1554_v57  ;;  %349 = vmatpush.msra.mxu1 %v1557_v58  ;;  %v1586_v58 = vld [vmem:[%s1321_s26 + $0x50] sm:$0xff] }
  0x3d   : > { %1954 = vst [vmem:[#allocation24_spill] sm:$0xff] %v1563_v59  ;;  %389 = vmatpush.msra.mxu3 %v1563_v59  ;;  %330 = vmatmul.f32.vlgmr.msra.gmra.mxu0 %v1565_v60  ;;  %v1592_v59 = vld [vmem:[%s1321_s26 + $0x30] sm:$0xff] }
  0x3e   : > { %1955 = vst [vmem:[#allocation25_spill] sm:$0xff] %v1565_v60  ;;  %350 = vmatmul.f32.vlgmr.msra.gmra.mxu1 %v1565_v60  ;;  %390 = vmatmul.f32.vlgmr.msra.gmra.mxu3 %v1565_v60 }
  0x3f   : > { %1956 = vst [vmem:[#allocation26_spill] sm:$0xff] %v1572_v61  ;;  %477 = vmatpush.msrb.mxu0 %v1335_v1  ;;  %366 = vmatpush.msra.mxu2 %v1582_v63 }
  0x40   : > { %1957 = vst [vmem:[#allocation27_spill] sm:$0xff] %v1582_v63  ;;  %497 = vmatpush.msrb.mxu1 %v1338_v2  ;;  %537 = vmatpush.msrb.mxu3 %v1341_v3 }
  0x41   : > { %1958 = vst [vmem:[#allocation28_spill] sm:$0xff] %v1586_v58  ;;  %478 = vmatpush.msrb.mxu0 %v1346_v4  ;;  %367 = vmatpush.msra.mxu2 %v1586_v58 }
  0x42   : > { %1959 = vst [vmem:[#allocation29_spill] sm:$0xff] %v1592_v59  ;;  %498 = vmatpush.msrb.mxu1 %v1349_v5  ;;  %538 = vmatpush.msrb.mxu3 %v1352_v6 }
  0x43   : > { %1960 = vst [vmem:[#allocation30_spill] sm:$0xff] %v1599_v0  ;;  %479 = vmatpush.msrb.mxu0 %v1356_v7  ;;  %368 = vmatpush.msra.mxu2 %v1592_v59  ;;  %v1961_v62 = vld [vmem:[#allocation23_spill] sm:$0xff] }
  0x44   : > { %499 = vmatpush.msrb.mxu1 %v1359_v8  ;;  %539 = vmatpush.msrb.mxu3 %v1364_v9 }
  0x45   : > { %480 = vmatpush.msrb.mxu0 %v1368_v10  ;;  %369 = vmatpush.msra.mxu2 %v1599_v0 }
  0x46   : > { %500 = vmatpush.msrb.mxu1 %v1371_v11  ;;  %370 = vmatmul.f32.vlgmr.msra.gmra.mxu2 %v1565_v60  ;;  %v1962_v60 = vld [vmem:[#allocation24_spill] sm:$0xff] }
  0x47   : > { %540 = vmatpush.msrb.mxu3 %v1376_v12  ;;  %517 = vmatpush.msrb.mxu2 %v1398_v18 }
  0x48   : > { %481 = vmatpush.msrb.mxu0 %v1380_v13  ;;  %501 = vmatpush.msrb.mxu1 %v1383_v14 }
  0x49   : > { %541 = vmatpush.msrb.mxu3 %v1388_v15  ;;  %518 = vmatpush.msrb.mxu2 %v1406_v20 }
  0x4a   : > { %482 = vmatpush.msrb.mxu0 %v1392_v16  ;;  %502 = vmatpush.msrb.mxu1 %v1395_v17 }
  0x4b   : > { %542 = vmatpush.msrb.mxu3 %v1403_v19  ;;  %519 = vmatpush.msrb.mxu2 %v1422_v24 }
  0x4c   : > { %483 = vmatpush.msrb.mxu0 %v1410_v21  ;;  %503 = vmatpush.msrb.mxu1 %v1413_v22 }
  0x4d   : > { %543 = vmatpush.msrb.mxu3 %v1419_v23  ;;  %520 = vmatpush.msrb.mxu2 %v1438_v28 }
  0x4e   : > { %484 = vmatpush.msrb.mxu0 %v1426_v25  ;;  %504 = vmatpush.msrb.mxu1 %v1429_v26 }
  0x4f   : > { %544 = vmatpush.msrb.mxu3 %v1435_v27  ;;  %521 = vmatpush.msrb.mxu2 %v1454_v32 }
  0x50   : > { %485 = vmatpush.msrb.mxu0 %v1442_v29  ;;  %505 = vmatpush.msrb.mxu1 %v1445_v30 }
  0x51   : > { %545 = vmatpush.msrb.mxu3 %v1451_v31  ;;  %522 = vmatpush.msrb.mxu2 %v1470_v36 }
  0x52   : > { %486 = vmatpush.msrb.mxu0 %v1458_v33  ;;  %506 = vmatpush.msrb.mxu1 %v1461_v34 }
  0x53   : > { %546 = vmatpush.msrb.mxu3 %v1467_v35  ;;  %523 = vmatpush.msrb.mxu2 %v1486_v40 }
  0x54   : > { %487 = vmatpush.msrb.mxu0 %v1474_v37  ;;  %507 = vmatpush.msrb.mxu1 %v1477_v38 }
  0x55   : > { %547 = vmatpush.msrb.mxu3 %v1483_v39  ;;  %524 = vmatpush.msrb.mxu2 %v1502_v44 }
  0x56   : > { %488 = vmatpush.msrb.mxu0 %v1490_v41  ;;  %508 = vmatpush.msrb.mxu1 %v1493_v42 }
  0x57   : > { %548 = vmatpush.msrb.mxu3 %v1499_v43  ;;  %525 = vmatpush.msrb.mxu2 %v1518_v48 }
  0x58   : > { %489 = vmatpush.msrb.mxu0 %v1506_v45  ;;  %509 = vmatpush.msrb.mxu1 %v1509_v46 }
  0x59   : > { %549 = vmatpush.msrb.mxu3 %v1515_v47  ;;  %526 = vmatpush.msrb.mxu2 %v1534_v52 }
  0x5a   : > { %490 = vmatpush.msrb.mxu0 %v1522_v49  ;;  %510 = vmatpush.msrb.mxu1 %v1525_v50 }
  0x5b   : > { %550 = vmatpush.msrb.mxu3 %v1531_v51  ;;  %527 = vmatpush.msrb.mxu2 %v1550_v56 }
  0x5c   : > { %491 = vmatpush.msrb.mxu0 %v1538_v53  ;;  %511 = vmatpush.msrb.mxu1 %v1541_v54 }
  0x5d   : > { %551 = vmatpush.msrb.mxu3 %v1547_v55  ;;  %528 = vmatpush.msrb.mxu2 %v1572_v61 }
  0x5e   : > { %492 = vmatpush.msrb.mxu0 %v1554_v57  ;;  %512 = vmatpush.msrb.mxu1 %v1961_v62 }
  0x5f   : > { %552 = vmatpush.msrb.mxu3 %v1962_v60  ;;  %529 = vmatpush.msrb.mxu2 %v1582_v63 }
  0x60   : > { %641 = vmatpush.msra.mxu0 %v1335_v1  ;;  %661 = vmatpush.msra.mxu1 %v1338_v2 }
  0x61   : > { %701 = vmatpush.msra.mxu3 %v1341_v3  ;;  %530 = vmatpush.msrb.mxu2 %v1586_v58 }
  0x62   : > { %642 = vmatpush.msra.mxu0 %v1346_v4  ;;  %662 = vmatpush.msra.mxu1 %v1349_v5 }
  0x63   : > { %702 = vmatpush.msra.mxu3 %v1352_v6  ;;  %531 = vmatpush.msrb.mxu2 %v1592_v59 }
  0x64   : > { %643 = vmatpush.msra.mxu0 %v1356_v7  ;;  %663 = vmatpush.msra.mxu1 %v1359_v8 }
  0x65   : > { %703 = vmatpush.msra.mxu3 %v1364_v9  ;;  %532 = vmatpush.msrb.mxu2 %v1599_v0 }
  0x66   : > { %644 = vmatpush.msra.mxu0 %v1368_v10  ;;  %664 = vmatpush.msra.mxu1 %v1371_v11 }
  0x67   : > { %681 = vmatpush.msra.mxu2 %v1398_v18  ;;  %704 = vmatpush.msra.mxu3 %v1376_v12 }
  0x68   : > { %645 = vmatpush.msra.mxu0 %v1380_v13  ;;  %665 = vmatpush.msra.mxu1 %v1383_v14 }
  0x69   : > { %682 = vmatpush.msra.mxu2 %v1406_v20  ;;  %705 = vmatpush.msra.mxu3 %v1388_v15 }
  0x6a   : > { %646 = vmatpush.msra.mxu0 %v1392_v16  ;;  %666 = vmatpush.msra.mxu1 %v1395_v17 }
  0x6b   : > { %683 = vmatpush.msra.mxu2 %v1422_v24  ;;  %706 = vmatpush.msra.mxu3 %v1403_v19 }
  0x6c   : > { %647 = vmatpush.msra.mxu0 %v1410_v21  ;;  %667 = vmatpush.msra.mxu1 %v1413_v22 }
  0x6d   : > { %684 = vmatpush.msra.mxu2 %v1438_v28  ;;  %707 = vmatpush.msra.mxu3 %v1419_v23 }
  0x6e   : > { %648 = vmatpush.msra.mxu0 %v1426_v25  ;;  %668 = vmatpush.msra.mxu1 %v1429_v26 }
  0x6f   : > { %685 = vmatpush.msra.mxu2 %v1454_v32  ;;  %708 = vmatpush.msra.mxu3 %v1435_v27 }
  0x70   : > { %649 = vmatpush.msra.mxu0 %v1442_v29  ;;  %669 = vmatpush.msra.mxu1 %v1445_v30 }
  0x71   : > { %686 = vmatpush.msra.mxu2 %v1470_v36  ;;  %709 = vmatpush.msra.mxu3 %v1451_v31 }
  0x72   : > { %650 = vmatpush.msra.mxu0 %v1458_v33  ;;  %670 = vmatpush.msra.mxu1 %v1461_v34 }
  0x73   : > { %687 = vmatpush.msra.mxu2 %v1486_v40  ;;  %710 = vmatpush.msra.mxu3 %v1467_v35 }
  0x74   : > { %651 = vmatpush.msra.mxu0 %v1474_v37  ;;  %671 = vmatpush.msra.mxu1 %v1477_v38 }
  0x75   : > { %688 = vmatpush.msra.mxu2 %v1502_v44  ;;  %711 = vmatpush.msra.mxu3 %v1483_v39 }
  0x76   : > { %652 = vmatpush.msra.mxu0 %v1490_v41  ;;  %672 = vmatpush.msra.mxu1 %v1493_v42 }
  0x77   : > { %689 = vmatpush.msra.mxu2 %v1518_v48  ;;  %712 = vmatpush.msra.mxu3 %v1499_v43  ;;  %v312_v43 = vld [vmem:[%s1326_s5 + $0x10] sm:$0xff] }
  0x78   : > { %653 = vmatpush.msra.mxu0 %v1506_v45  ;;  %673 = vmatpush.msra.mxu1 %v1509_v46 }
  0x79   : > { %690 = vmatpush.msra.mxu2 %v1534_v52  ;;  %713 = vmatpush.msra.mxu3 %v1515_v47 }
  0x7a   : > { %654 = vmatpush.msra.mxu0 %v1522_v49  ;;  %674 = vmatpush.msra.mxu1 %v1525_v50 }
  0x7b   : > { %691 = vmatpush.msra.mxu2 %v1550_v56  ;;  %714 = vmatpush.msra.mxu3 %v1531_v51  ;;  %v311_v51 = vld [vmem:[%s1326_s5 + $0x8] sm:$0xff]  ;;  %v461_v56 = vstv %s1314_s19 }
  0x7c   : > { %655 = vmatpush.msra.mxu0 %v1538_v53  ;;  %675 = vmatpush.msra.mxu1 %v1541_v54  ;;  %v310_v53 = vld [vmem:[%s1326_s5] sm:$0xff] }
  0x7d   : > { %692 = vmatpush.msra.mxu2 %v1572_v61  ;;  %715 = vmatpush.msra.mxu3 %v1547_v55 }
  0x7e   : > { %656 = vmatpush.msra.mxu0 %v1554_v57  ;;  %676 = vmatpush.msra.mxu1 %v1961_v62 }
  0x7f   : > { %693 = vmatpush.msra.mxu2 %v1582_v63  ;;  %716 = vmatpush.msra.mxu3 %v1962_v60  ;;  %v313_v63 = vld [vmem:[%s1326_s5 + $0x18] sm:$0xff] }
  0x81   : > { %694 = vmatpush.msra.mxu2 %v1586_v58 }
  0x83   : > { %695 = vmatpush.msra.mxu2 %v1592_v59 }
  0x85   : > { %696 = vmatpush.msra.mxu2 %v1599_v0 }
  0xad   : > { %v1733_v37 = vpop.permute.xlu0 %305 }
  0xae   : > { %vm1736_vm8 = vcmp.lt.s32.totalorder %v461_v56, %v1733_v37 }
  0xba   : > { %v331_v54 = vpop.f32.mrf.mxu0 }
  0xbb   : > { %v394_v50 = vadd.f32 %v331_v54, %v310_v53  ;;  %v351_v55 = vpop.f32.mrf.mxu1 }
  0xbc   : > { %v395_v49 = vadd.f32 %v351_v55, %v311_v51 }
  0xbd   : > { %v1080_v57 = vmul.f32 -1.442695, %v394_v50 }
  0xbe   : > { %v1081_v47 = vmul.f32 -1.442695, %v395_v49 }
  0xbf   : > { %1155 = vpow2.f32 %v1080_v57 }
  0xc0   : > { %1157 = vpow2.f32 %v1081_v47 }
  0xc1   : > { %v391_v62 = vpop.f32.mrf.mxu3 }
  0xc2   : > { %v397_v60 = vadd.f32 %v391_v62, %v313_v63 }
  0xc4   : > { %v1082_v46 = vmul.f32 -1.442695, %v397_v60 }
  0xc5   : > { %v1156_v58 = vpop.eup %1155 }
  0xc6   : > { %v1158_v45 = vpop.eup %1157  ;;  %v401_v59 = vadd.f32 1.0, %v1156_v58  ;;  %1159 = vpow2.f32 %v1082_v46 }
  0xc7   : > { %v420_v0 = vadd.f32 1.0, %v1158_v45 }
  0xc8   : > { %1161 = vrcp.f32 %v401_v59  ;;  %v413_v62 = vand.u32 2147483648, %v401_v59  ;;  %v411_v45 = vand.u32 2147483647, %v401_v59  ;;  %vm407_vm2 = vweird.f32 %v401_v59 }
  0xc9   : > { %1163 = vrcp.f32 %v420_v0  ;;  %v371_v53 = vpop.f32.mrf.mxu2  ;;  %v432_v61 = vand.u32 2147483648, %v420_v0  ;;  %v430_v42 = vand.u32 2147483647, %v420_v0  ;;  %vm426_vm3 = vweird.f32 %v420_v0 }
  0xca   : > { %v396_v51 = vadd.f32 %v371_v53, %v312_v43  ;;  %v414_v39 = vor.u32 1.1754944e-38, %v413_v62  ;;  %vm412_vm5 = vcmp.eq.f32.partialorder %v411_v45, 8.507059e+37 }
  0xcb   : > { %vm431_vm7 = vcmp.eq.f32.partialorder %v430_v42, 8.507059e+37 }
  0xcc   : > { %v1160_v54 = vpop.eup %1159 }
  0xcd   : > { %v440_v55 = vadd.f32 1.0, %v1160_v54 }
  0xce   : > { %v1162_v50 = vpop.eup %1161 }
  0xcf   : > { %v1164_v49 = vpop.eup %1163  ;;  %v403_v57 = vmul.f32 %v1162_v50, %v401_v59  ;;  %1165 = vrcp.f32 %v440_v55  ;;  %vm408_vm0 = vweird.f32 %v1162_v50  ;;  %vm446_vm10 = vweird.f32 %v440_v55 }
  0xd0   : > { %v422_v47 = vmul.f32 %v1164_v49, %v420_v0  ;;  %1167 = vtanh.f32 %v396_v51  ;;  %vm427_vm1 = vweird.f32 %v1164_v49  ;;  %vm409_vm4 = vmor %vm407_vm2, %vm408_vm0  ;;  %v450_v42 = vand.u32 2147483647, %v440_v55 }
  0xd1   : > { %v404_v63 = vsub.f32 1.0, %v403_v57  ;;  %vm428_vm6 = vmor %vm426_vm3, %vm427_vm1 }
  0xd2   : > { %v423_v60 = vsub.f32 1.0, %v422_v47  ;;  %v309_v47 = vld [vmem:[#allocation3] sm:$0xff]  ;;  %vm451_vm12 = vcmp.eq.f32.partialorder %v450_v42, 8.507059e+37 }
  0xd3   : > { %v405_v58 = vmul.f32 %v1162_v50, %v404_v63  ;;  %v433_v63 = vor.u32 1.1754944e-38, %v432_v61  ;;  %v452_v61 = vand.u32 2147483648, %v440_v55 }
  0xd4   : > { %v424_v46 = vmul.f32 %v1164_v49, %v423_v60 }
  0xd5   : > { %v1166_v41 = vpop.eup %1165  ;;  %v406_v43 = vadd.f32 %v1162_v50, %v405_v58 }
  0xd6   : > { %v1168_v53 = vpop.eup %1167  ;;  %v442_v54 = vmul.f32 %v1166_v41, %v440_v55  ;;  %v425_v51 = vadd.f32 %v1164_v49, %v424_v46  ;;  %vm447_vm9 = vweird.f32 %v1166_v41 }
  0xd7   : > { %v410_v57 = vsel %vm409_vm4, %v1162_v50, %v406_v43  ;;  %vm448_vm11 = vmor %vm446_vm10, %vm447_vm9  ;;  %v1965_v43 = vld [vmem:[#allocation25_spill] sm:$0xff] }
  0xd8   : > { %v443_v38 = vsub.f32 1.0, %v442_v54  ;;  %v415_v60 = vsel %vm412_vm5, %v414_v39, %v410_v57  ;;  %v429_v35 = vsel %vm428_vm6, %v1164_v49, %v425_v51  ;;  %v1085_v57 = vld [vmem:[%s1326_s5 + $0x30] sm:$0xff] }
  0xd9   : > { %v457_v59 = vmul.f32 %v1168_v53, %v415_v60  ;;  %v434_v58 = vsel %vm431_vm7, %v433_v63, %v429_v35 }
  0xda   : > { %v444_v0 = vmul.f32 %v1166_v41, %v443_v38  ;;  %v456_v52 = vmul.f32 %v434_v58, %v309_v47  ;;  %v453_v38 = vor.u32 1.1754944e-38, %v452_v61 }
  0xdc   : > { %v458_v50 = vadd.f32 %v457_v59, %v456_v52  ;;  %v445_v45 = vadd.f32 %v1166_v41, %v444_v0 }
  0xde   : > { %1169 = vtanh.f32 %v458_v50  ;;  %v1742_v39 = vsel %vm1736_vm8, %v458_v50, %v309_v47  ;;  %v449_v35 = vsel %vm448_vm11, %v1166_v41, %v445_v45 }
  0xdf   : > { %v454_v49 = vsel %vm451_vm12, %v453_v38, %v449_v35 }
  0xe4   : > { %v1170_v56 = vpop.eup %1169 }
  0xe5   : > { %v460_v46 = vmul.f32 %v1170_v56, %v454_v49 }
  0xe7   : > { %v1747_v52 = vsel %vm1736_vm8, %v460_v46, %v1965_v43  ;;  %v467_v53 = vsel %vm1736_vm8, %v460_v46, 0.0 }
  0xe8   : > { %468 = vst [vmem:[%s1331_s10] sm:$0xff] %v467_v53  ;;  %493 = vmatmul.f32.vlgmr.msrb.gmra.mxu0 %v1747_v52  ;;  %513 = vmatmul.f32.vlgmr.msrb.gmra.mxu1 %v1747_v52 }
  0xe9   : > { %533 = vmatmul.f32.vlgmr.msrb.gmra.mxu2 %v1747_v52  ;;  %553 = vmatmul.f32.vlgmr.msrb.gmra.mxu3 %v1747_v52 }
  0xea   : > { %805 = vmatpush.msrb.mxu0 %v1335_v1  ;;  %825 = vmatpush.msrb.mxu1 %v1338_v2  ;;  %v1966_v1 = vld [vmem:[#allocation17_spill] sm:$0xff]  ;;  %v1967_v2 = vld [vmem:[#allocation4_spill] sm:$0xff] }
  0xeb   : > { %845 = vmatpush.msrb.mxu2 %v1398_v18  ;;  %865 = vmatpush.msrb.mxu3 %v1341_v3  ;;  %v1968_v3 = vld [vmem:[#allocation5_spill] sm:$0xff]  ;;  %v1983_v18 = vld [vmem:[#allocation16_spill] sm:$0xff] }
  0xec   : > { %806 = vmatpush.msrb.mxu0 %v1346_v4  ;;  %826 = vmatpush.msrb.mxu1 %v1349_v5  ;;  %v1969_v4 = vld [vmem:[#allocation6_spill] sm:$0xff]  ;;  %v1970_v5 = vld [vmem:[#allocation21_spill] sm:$0xff] }
  0xed   : > { %846 = vmatpush.msrb.mxu2 %v1406_v20  ;;  %866 = vmatpush.msrb.mxu3 %v1352_v6  ;;  %v1971_v6 = vld [vmem:[#allocation7_spill] sm:$0xff] }
  0xee   : > { %807 = vmatpush.msrb.mxu0 %v1356_v7  ;;  %827 = vmatpush.msrb.mxu1 %v1359_v8  ;;  %v1972_v7 = vld [vmem:[#allocation8_spill] sm:$0xff]  ;;  %v1973_v8 = vld [vmem:[#allocation9_spill] sm:$0xff]  ;;  %v1985_v20 = vld [vmem:[#allocation19_spill] sm:$0xff] }
  0xef   : > { %847 = vmatpush.msrb.mxu2 %v1422_v24  ;;  %867 = vmatpush.msrb.mxu3 %v1364_v9  ;;  %v1974_v9 = vld [vmem:[#allocation26_spill] sm:$0xff]  ;;  %v1989_v24 = vld [vmem:[#allocation23_spill] sm:$0xff] }
  0xf0   : > { %808 = vmatpush.msrb.mxu0 %v1368_v10  ;;  %828 = vmatpush.msrb.mxu1 %v1371_v11  ;;  %v1975_v10 = vld [vmem:[#allocation10_spill] sm:$0xff]  ;;  %v1976_v11 = vld [vmem:[#allocation11_spill] sm:$0xff] }
  0xf1   : > { %848 = vmatpush.msrb.mxu2 %v1438_v28  ;;  %868 = vmatpush.msrb.mxu3 %v1376_v12  ;;  %v1977_v12 = vld [vmem:[#allocation12_spill] sm:$0xff]  ;;  %v1084_v28 = vld [vmem:[%s1326_s5 + $0x28] sm:$0xff] }
  0xf2   : > { %809 = vmatpush.msrb.mxu0 %v1380_v13  ;;  %829 = vmatpush.msrb.mxu1 %v1383_v14  ;;  %v1978_v13 = vld [vmem:[#allocation27_spill] sm:$0xff]  ;;  %v1979_v14 = vld [vmem:[#allocation13_spill] sm:$0xff] }
  0xf3   : > { %849 = vmatpush.msrb.mxu2 %v1454_v32  ;;  %869 = vmatpush.msrb.mxu3 %v1388_v15  ;;  %v1980_v15 = vld [vmem:[#allocation14_spill] sm:$0xff] }
  0xf4   : > { %810 = vmatpush.msrb.mxu0 %v1392_v16  ;;  %830 = vmatpush.msrb.mxu1 %v1395_v17  ;;  %v1981_v16 = vld [vmem:[#allocation15_spill] sm:$0xff]  ;;  %v1982_v17 = vld [vmem:[#allocation28_spill] sm:$0xff] }
  0xf5   : > { %850 = vmatpush.msrb.mxu2 %v1470_v36  ;;  %870 = vmatpush.msrb.mxu3 %v1403_v19  ;;  %v1984_v19 = vld [vmem:[#allocation18_spill] sm:$0xff]  ;;  %v1086_v36 = vld [vmem:[%s1326_s5 + $0x38] sm:$0xff] }
  0xf6   : > { %811 = vmatpush.msrb.mxu0 %v1410_v21  ;;  %831 = vmatpush.msrb.mxu1 %v1413_v22  ;;  %v1986_v21 = vld [vmem:[#allocation29_spill] sm:$0xff]  ;;  %v1987_v22 = vld [vmem:[#allocation20_spill] sm:$0xff] }
  0xf7   : > { %851 = vmatpush.msrb.mxu2 %v1486_v40  ;;  %871 = vmatpush.msrb.mxu3 %v1419_v23  ;;  %v1988_v23 = vld [vmem:[#allocation22_spill] sm:$0xff] }
  0xf8   : > { %812 = vmatpush.msrb.mxu0 %v1426_v25  ;;  %832 = vmatpush.msrb.mxu1 %v1429_v26  ;;  %v1990_v25 = vld [vmem:[#allocation30_spill] sm:$0xff]  ;;  %v1991_v26 = vld [vmem:[#allocation24_spill] sm:$0xff] }
  0xf9   : > { %852 = vmatpush.msrb.mxu2 %v1502_v44  ;;  %872 = vmatpush.msrb.mxu3 %v1435_v27  ;;  %v1083_v27 = vld [vmem:[%s1326_s5 + $0x20] sm:$0xff] }
  0xfa   : > { %813 = vmatpush.msrb.mxu0 %v1442_v29  ;;  %833 = vmatpush.msrb.mxu1 %v1445_v30 }
  0xfb   : > { %853 = vmatpush.msrb.mxu2 %v1518_v48  ;;  %873 = vmatpush.msrb.mxu3 %v1451_v31 }
  0xfc   : > { %814 = vmatpush.msrb.mxu0 %v1458_v33  ;;  %834 = vmatpush.msrb.mxu1 %v1461_v34 }
  0xfd   : > { %854 = vmatpush.msrb.mxu2 %v1966_v1  ;;  %874 = vmatpush.msrb.mxu3 %v1967_v2 }
  0xfe   : > { %815 = vmatpush.msrb.mxu0 %v1968_v3  ;;  %835 = vmatpush.msrb.mxu1 %v1969_v4 }
  0xff   : > { %855 = vmatpush.msrb.mxu2 %v1970_v5  ;;  %875 = vmatpush.msrb.mxu3 %v1971_v6 }
 0x100   : > { %816 = vmatpush.msrb.mxu0 %v1972_v7  ;;  %836 = vmatpush.msrb.mxu1 %v1973_v8 }
 0x101   : > { %856 = vmatpush.msrb.mxu2 %v1974_v9  ;;  %876 = vmatpush.msrb.mxu3 %v1975_v10 }
 0x102   : > { %817 = vmatpush.msrb.mxu0 %v1976_v11  ;;  %837 = vmatpush.msrb.mxu1 %v1977_v12  ;;  %v624_v12 = vstv %s469_s13 }
 0x103   : > { %857 = vmatpush.msrb.mxu2 %v1978_v13  ;;  %877 = vmatpush.msrb.mxu3 %v1979_v14  ;;  %vm625_vm5 = vcmp.lt.s32.totalorder %v624_v12, %v1733_v37 }
 0x104   : > { %818 = vmatpush.msrb.mxu0 %v1980_v15  ;;  %838 = vmatpush.msrb.mxu1 %v1981_v16 }
 0x105   : > { %858 = vmatpush.msrb.mxu2 %v1982_v17  ;;  %878 = vmatpush.msrb.mxu3 %v1983_v18 }
 0x106   : > { %819 = vmatpush.msrb.mxu0 %v1984_v19  ;;  %839 = vmatpush.msrb.mxu1 %v1985_v20 }
 0x107   : > { %859 = vmatpush.msrb.mxu2 %v1986_v21  ;;  %879 = vmatpush.msrb.mxu3 %v1987_v22 }
 0x108   : > { %820 = vmatpush.msrb.mxu0 %v1988_v23  ;;  %840 = vmatpush.msrb.mxu1 %v1989_v24 }
 0x109   : > { %860 = vmatpush.msrb.mxu2 %v1990_v25  ;;  %880 = vmatpush.msrb.mxu3 %v1991_v26  ;;  %v1091_v26 = vld [vmem:[%s1326_s5 + $0x40] sm:$0xff] }
 0x165   : > { %v494_v29 = vpop.f32.mrf.mxu0  ;;  %v514_v30 = vpop.f32.mrf.mxu1 }
 0x166   : > { %v557_v31 = vadd.f32 %v1083_v27, %v494_v29  ;;  %v558_v32 = vadd.f32 %v1084_v28, %v514_v30  ;;  %v1092_v27 = vld [vmem:[%s1326_s5 + $0x48] sm:$0xff] }
 0x168   : > { %v1087_v33 = vmul.f32 -1.442695, %v557_v31  ;;  %v1088_v34 = vmul.f32 -1.442695, %v558_v32 }
 0x16a   : > { %1171 = vpow2.f32 %v1087_v33  ;;  %v1094_v33 = vld [vmem:[%s1326_s5 + $0x58] sm:$0xff] }
 0x16b   : > { %1173 = vpow2.f32 %v1088_v34 }
 0x16c   : > { %v554_v40 = vpop.f32.mrf.mxu3  ;;  %v534_v47 = vpop.f32.mrf.mxu2 }
 0x16d   : > { %v560_v41 = vadd.f32 %v1086_v36, %v554_v40  ;;  %v559_v58 = vadd.f32 %v1085_v57, %v534_v47 }
 0x16f   : > { %v1089_v44 = vmul.f32 -1.442695, %v560_v41 }
 0x170   : > { %v1172_v48 = vpop.eup %1171 }
 0x171   : > { %v1174_v55 = vpop.eup %1173  ;;  %v564_v54 = vadd.f32 1.0, %v1172_v48  ;;  %1175 = vpow2.f32 %v1089_v44 }
 0x172   : > { %v583_v51 = vadd.f32 1.0, %v1174_v55 }
 0x173   : > { %1177 = vrcp.f32 %v564_v54  ;;  %v576_v42 = vand.u32 2147483648, %v564_v54  ;;  %v574_v56 = vand.u32 2147483647, %v564_v54  ;;  %vm570_vm15 = vweird.f32 %v564_v54 }
 0x174   : > { %1179 = vrcp.f32 %v583_v51  ;;  %v595_v35 = vand.u32 2147483648, %v583_v51  ;;  %v593_v46 = vand.u32 2147483647, %v583_v51  ;;  %vm589_vm0 = vweird.f32 %v583_v51 }
 0x175   : > { %v577_v1 = vor.u32 1.1754944e-38, %v576_v42  ;;  %vm575_vm3 = vcmp.eq.f32.partialorder %v574_v56, 8.507059e+37 }
 0x176   : > { %v596_v4 = vor.u32 1.1754944e-38, %v595_v35  ;;  %vm594_vm4 = vcmp.eq.f32.partialorder %v593_v46, 8.507059e+37 }
 0x177   : > { %v1176_v63 = vpop.eup %1175 }
 0x178   : > { %v603_v60 = vadd.f32 1.0, %v1176_v63 }
 0x179   : > { %v1178_v59 = vpop.eup %1177 }
 0x17a   : > { %v1180_v0 = vpop.eup %1179  ;;  %v566_v62 = vmul.f32 %v1178_v59, %v564_v54  ;;  %1181 = vrcp.f32 %v603_v60  ;;  %vm571_vm13 = vweird.f32 %v1178_v59  ;;  %v615_v18 = vand.u32 2147483648, %v603_v60  ;;  %v1093_v54 = vld [vmem:[%s1326_s5 + $0x50] sm:$0xff] }
 0x17b   : > { %v585_v50 = vmul.f32 %v1180_v0, %v583_v51  ;;  %1183 = vtanh.f32 %v559_v58  ;;  %vm590_vm14 = vweird.f32 %v1180_v0  ;;  %vm572_vm1 = vmor %vm570_vm15, %vm571_vm13  ;;  %vm609_vm7 = vweird.f32 %v603_v60 }
 0x17c   : > { %v567_v45 = vsub.f32 1.0, %v566_v62  ;;  %vm591_vm2 = vmor %vm589_vm0, %vm590_vm14  ;;  %v613_v19 = vand.u32 2147483647, %v603_v60  ;;  %v616_v21 = vor.u32 1.1754944e-38, %v615_v18 }
 0x17d   : > { %v586_v61 = vsub.f32 1.0, %v585_v50 }
 0x17e   : > { %v568_v38 = vmul.f32 %v1178_v59, %v567_v45  ;;  %vm614_vm9 = vcmp.eq.f32.partialorder %v613_v19, 8.507059e+37 }
 0x17f   : > { %v587_v49 = vmul.f32 %v1180_v0, %v586_v61 }
 0x180   : > { %v1182_v43 = vpop.eup %1181  ;;  %v569_v53 = vadd.f32 %v1178_v59, %v568_v38 }
 0x181   : > { %v588_v2 = vadd.f32 %v1180_v0, %v587_v49  ;;  %v605_v3 = vmul.f32 %v1182_v43, %v603_v60  ;;  %v1184_v6 = vpop.eup %1183  ;;  %vm610_vm6 = vweird.f32 %v1182_v43 }
 0x182   : > { %v573_v5 = vsel %vm572_vm1, %v1178_v59, %v569_v53  ;;  %vm611_vm8 = vmor %vm609_vm7, %vm610_vm6 }
 0x183   : > { %v578_v7 = vsel %vm575_vm3, %v577_v1, %v573_v5  ;;  %v592_v8 = vsel %vm591_vm2, %v1180_v0, %v588_v2  ;;  %v606_v9 = vsub.f32 1.0, %v605_v3 }
 0x184   : > { %v597_v10 = vsel %vm594_vm4, %v596_v4, %v592_v8  ;;  %v620_v11 = vmul.f32 %v1184_v6, %v578_v7 }
 0x185   : > { %v619_v13 = vmul.f32 %v597_v10, %v1742_v39  ;;  %v607_v14 = vmul.f32 %v1182_v43, %v606_v9  ;;  %v788_v10 = vstv %s633_s20 }
 0x186   : > { %vm789_vm2 = vcmp.lt.s32.totalorder %v788_v10, %v1733_v37 }
 0x187   : > { %v621_v15 = vadd.f32 %v620_v11, %v619_v13  ;;  %v608_v16 = vadd.f32 %v1182_v43, %v607_v14 }
 0x189   : > { %1185 = vtanh.f32 %v621_v15  ;;  %v1830_v17 = vsel %vm625_vm5, %v621_v15, %v1742_v39  ;;  %v612_v20 = vsel %vm611_vm8, %v1182_v43, %v608_v16 }
 0x18a   : > { %v617_v23 = vsel %vm614_vm9, %v616_v21, %v612_v20 }
 0x18f   : > { %v1186_v22 = vpop.eup %1185 }
 0x190   : > { %v623_v24 = vmul.f32 %v1186_v22, %v617_v23 }
 0x192   : > { %v1835_v25 = vsel %vm625_vm5, %v623_v24, %v1747_v52  ;;  %v630_v39 = vsel %vm625_vm5, %v623_v24, 0.0 }
 0x193   : > { %1090 = vst [vmem:[%s1331_s10 + $0x8] sm:$0xff] %v630_v39  ;;  %657 = vmatmul.f32.vlgmr.msra.gmra.mxu0 %v1835_v25  ;;  %677 = vmatmul.f32.vlgmr.msra.gmra.mxu1 %v1835_v25  ;;  %v1099_v39 = vld [vmem:[%s1326_s5 + $0x60] sm:$0xff] }
 0x194   : > { %697 = vmatmul.f32.vlgmr.msra.gmra.mxu2 %v1835_v25  ;;  %717 = vmatmul.f32.vlgmr.msra.gmra.mxu3 %v1835_v25 }
 0x210   : > { %v658_v28 = vpop.f32.mrf.mxu0  ;;  %v678_v29 = vpop.f32.mrf.mxu1 }
 0x211   : > { %v721_v30 = vadd.f32 %v1091_v26, %v658_v28  ;;  %v722_v52 = vadd.f32 %v1092_v27, %v678_v29  ;;  %v1100_v26 = vld [vmem:[%s1326_s5 + $0x68] sm:$0xff] }
 0x213   : > { %v1095_v31 = vmul.f32 -1.442695, %v721_v30  ;;  %v1096_v32 = vmul.f32 -1.442695, %v722_v52 }
 0x215   : > { %1187 = vpow2.f32 %v1095_v31  ;;  %v1102_v31 = vld [vmem:[%s1326_s5 + $0x78] sm:$0xff] }
 0x216   : > { %1189 = vpow2.f32 %v1096_v32 }
 0x217   : > { %v718_v34 = vpop.f32.mrf.mxu3  ;;  %v698_v51 = vpop.f32.mrf.mxu2 }
 0x218   : > { %v724_v36 = vadd.f32 %v1094_v33, %v718_v34  ;;  %v723_v60 = vadd.f32 %v1093_v54, %v698_v51 }
 0x21a   : > { %v1097_v40 = vmul.f32 -1.442695, %v724_v36 }
 0x21b   : > { %v1188_v41 = vpop.eup %1187 }
 0x21c   : > { %v1190_v44 = vpop.eup %1189  ;;  %v728_v48 = vadd.f32 1.0, %v1188_v41  ;;  %1191 = vpow2.f32 %v1097_v40 }
 0x21d   : > { %v747_v55 = vadd.f32 1.0, %v1190_v44 }
 0x21e   : > { %1193 = vrcp.f32 %v728_v48  ;;  %v740_v45 = vand.u32 2147483648, %v728_v48  ;;  %v738_v35 = vand.u32 2147483647, %v728_v48  ;;  %vm734_vm12 = vweird.f32 %v728_v48 }
 0x21f   : > { %1195 = vrcp.f32 %v747_v55  ;;  %v759_v61 = vand.u32 2147483648, %v747_v55  ;;  %v757_v56 = vand.u32 2147483647, %v747_v55  ;;  %vm753_vm13 = vweird.f32 %v747_v55 }
 0x220   : > { %v741_v43 = vor.u32 1.1754944e-38, %v740_v45  ;;  %vm739_vm0 = vcmp.eq.f32.partialorder %v738_v35, 8.507059e+37 }
 0x221   : > { %v760_v2 = vor.u32 1.1754944e-38, %v759_v61  ;;  %vm758_vm1 = vcmp.eq.f32.partialorder %v757_v56, 8.507059e+37 }
 0x222   : > { %v1192_v57 = vpop.eup %1191 }
 0x223   : > { %v767_v47 = vadd.f32 1.0, %v1192_v57 }
 0x224   : > { %v1194_v63 = vpop.eup %1193 }
 0x225   : > { %v1196_v59 = vpop.eup %1195  ;;  %v730_v58 = vmul.f32 %v1194_v63, %v728_v48  ;;  %1197 = vrcp.f32 %v767_v47  ;;  %vm735_vm10 = vweird.f32 %v1194_v63  ;;  %v779_v16 = vand.u32 2147483648, %v767_v47  ;;  %v1101_v48 = vld [vmem:[%s1326_s5 + $0x70] sm:$0xff] }
 0x226   : > { %v749_v0 = vmul.f32 %v1196_v59, %v747_v55  ;;  %1199 = vtanh.f32 %v723_v60  ;;  %vm754_vm11 = vweird.f32 %v1196_v59  ;;  %vm736_vm14 = vmor %vm734_vm12, %vm735_vm10  ;;  %vm773_vm4 = vweird.f32 %v767_v47 }
 0x227   : > { %v731_v62 = vsub.f32 1.0, %v730_v58  ;;  %vm755_vm15 = vmor %vm753_vm13, %vm754_vm11  ;;  %v777_v18 = vand.u32 2147483647, %v767_v47  ;;  %v780_v20 = vor.u32 1.1754944e-38, %v779_v16 }
 0x228   : > { %v750_v50 = vsub.f32 1.0, %v749_v0 }
 0x229   : > { %v732_v42 = vmul.f32 %v1194_v63, %v731_v62  ;;  %vm778_vm6 = vcmp.eq.f32.partialorder %v777_v18, 8.507059e+37 }
 0x22a   : > { %v751_v38 = vmul.f32 %v1196_v59, %v750_v50 }
 0x22b   : > { %v1198_v49 = vpop.eup %1197  ;;  %v733_v46 = vadd.f32 %v1194_v63, %v732_v42 }
 0x22c   : > { %v752_v53 = vadd.f32 %v1196_v59, %v751_v38  ;;  %v769_v1 = vmul.f32 %v1198_v49, %v767_v47  ;;  %v1200_v4 = vpop.eup %1199  ;;  %vm774_vm3 = vweird.f32 %v1198_v49 }
 0x22d   : > { %v737_v3 = vsel %vm736_vm14, %v1194_v63, %v733_v46  ;;  %vm775_vm5 = vmor %vm773_vm4, %vm774_vm3 }
 0x22e   : > { %v742_v5 = vsel %vm739_vm0, %v741_v43, %v737_v3  ;;  %v756_v6 = vsel %vm755_vm15, %v1196_v59, %v752_v53  ;;  %v770_v7 = vsub.f32 1.0, %v769_v1 }
 0x22f   : > { %v761_v8 = vsel %vm758_vm1, %v760_v2, %v756_v6  ;;  %v784_v9 = vmul.f32 %v1200_v4, %v742_v5 }
 0x230   : > { %v783_v11 = vmul.f32 %v761_v8, %v1830_v17  ;;  %v771_v12 = vmul.f32 %v1198_v49, %v770_v7  ;;  %v952_v8 = vstv %s797_s21 }
 0x231   : > { %vm953_vm15 = vcmp.lt.s32.totalorder %v952_v8, %v1733_v37 }
 0x232   : > { %v785_v13 = vadd.f32 %v784_v9, %v783_v11  ;;  %v772_v14 = vadd.f32 %v1198_v49, %v771_v12 }
 0x234   : > { %1201 = vtanh.f32 %v785_v13  ;;  %v1854_v15 = vsel %vm789_vm2, %v785_v13, %v1830_v17  ;;  %v776_v19 = vsel %vm775_vm5, %v1198_v49, %v772_v14 }
 0x235   : > { %v781_v22 = vsel %vm778_vm6, %v780_v20, %v776_v19 }
 0x23a   : > { %v1202_v21 = vpop.eup %1201 }
 0x23b   : > { %v787_v23 = vmul.f32 %v1202_v21, %v781_v22 }
 0x23d   : > { %v1859_v24 = vsel %vm789_vm2, %v787_v23, %v1835_v25  ;;  %v794_v17 = vsel %vm789_vm2, %v787_v23, 0.0 }
 0x23e   : > { %1098 = vst [vmem:[%s1331_s10 + $0x10] sm:$0xff] %v794_v17  ;;  %821 = vmatmul.f32.vlgmr.msrb.gmra.mxu0 %v1859_v24  ;;  %841 = vmatmul.f32.vlgmr.msrb.gmra.mxu1 %v1859_v24 }
 0x23f   : > { %861 = vmatmul.f32.vlgmr.msrb.gmra.mxu2 %v1859_v24  ;;  %881 = vmatmul.f32.vlgmr.msrb.gmra.mxu3 %v1859_v24 }
 0x2bb   : > { %v822_v27 = vpop.f32.mrf.mxu0  ;;  %v842_v28 = vpop.f32.mrf.mxu1 }
 0x2bc   : > { %v885_v29 = vadd.f32 %v1099_v39, %v822_v27  ;;  %v886_v25 = vadd.f32 %v1100_v26, %v842_v28 }
 0x2be   : > { %v1103_v30 = vmul.f32 -1.442695, %v885_v29  ;;  %v1104_v52 = vmul.f32 -1.442695, %v886_v25 }
 0x2c0   : > { %1203 = vpow2.f32 %v1103_v30 }
 0x2c1   : > { %1205 = vpow2.f32 %v1104_v52 }
 0x2c2   : > { %v882_v32 = vpop.f32.mrf.mxu3  ;;  %v862_v55 = vpop.f32.mrf.mxu2 }
 0x2c3   : > { %v888_v33 = vadd.f32 %v1102_v31, %v882_v32  ;;  %v887_v47 = vadd.f32 %v1101_v48, %v862_v55 }
 0x2c5   : > { %v1105_v34 = vmul.f32 -1.442695, %v888_v33 }
 0x2c6   : > { %v1204_v36 = vpop.eup %1203 }
 0x2c7   : > { %v1206_v40 = vpop.eup %1205  ;;  %v892_v41 = vadd.f32 1.0, %v1204_v36  ;;  %1207 = vpow2.f32 %v1105_v34 }
 0x2c8   : > { %v911_v44 = vadd.f32 1.0, %v1206_v40 }
 0x2c9   : > { %1209 = vrcp.f32 %v892_v41  ;;  %v904_v62 = vand.u32 2147483648, %v892_v41  ;;  %v902_v61 = vand.u32 2147483647, %v892_v41  ;;  %vm898_vm9 = vweird.f32 %v892_v41 }
 0x2ca   : > { %1211 = vrcp.f32 %v911_v44  ;;  %v923_v50 = vand.u32 2147483648, %v911_v44  ;;  %v921_v35 = vand.u32 2147483647, %v911_v44  ;;  %vm917_vm10 = vweird.f32 %v911_v44 }
 0x2cb   : > { %v905_v49 = vor.u32 1.1754944e-38, %v904_v62  ;;  %vm903_vm13 = vcmp.eq.f32.partialorder %v902_v61, 8.507059e+37 }
 0x2cc   : > { %v924_v53 = vor.u32 1.1754944e-38, %v923_v50  ;;  %vm922_vm14 = vcmp.eq.f32.partialorder %v921_v35, 8.507059e+37 }
 0x2cd   : > { %v1208_v54 = vpop.eup %1207 }
 0x2ce   : > { %v931_v51 = vadd.f32 1.0, %v1208_v54 }
 0x2cf   : > { %v1210_v57 = vpop.eup %1209 }
 0x2d0   : > { %v1212_v63 = vpop.eup %1211  ;;  %v894_v60 = vmul.f32 %v1210_v57, %v892_v41  ;;  %1213 = vrcp.f32 %v931_v51  ;;  %vm899_vm7 = vweird.f32 %v1210_v57  ;;  %v943_v14 = vand.u32 2147483648, %v931_v51 }
 0x2d1   : > { %v913_v59 = vmul.f32 %v1212_v63, %v911_v44  ;;  %1215 = vtanh.f32 %v887_v47  ;;  %vm918_vm8 = vweird.f32 %v1212_v63  ;;  %vm900_vm11 = vmor %vm898_vm9, %vm899_vm7  ;;  %vm937_vm1 = vweird.f32 %v931_v51 }
 0x2d2   : > { %v895_v58 = vsub.f32 1.0, %v894_v60  ;;  %vm919_vm12 = vmor %vm917_vm10, %vm918_vm8  ;;  %v941_v16 = vand.u32 2147483647, %v931_v51  ;;  %v944_v19 = vor.u32 1.1754944e-38, %v943_v14 }
 0x2d3   : > { %v914_v0 = vsub.f32 1.0, %v913_v59 }
 0x2d4   : > { %v896_v45 = vmul.f32 %v1210_v57, %v895_v58  ;;  %vm942_vm3 = vcmp.eq.f32.partialorder %v941_v16, 8.507059e+37 }
 0x2d5   : > { %v915_v42 = vmul.f32 %v1212_v63, %v914_v0 }
 0x2d6   : > { %v1214_v38 = vpop.eup %1213  ;;  %v897_v56 = vadd.f32 %v1210_v57, %v896_v45 }
 0x2d7   : > { %v916_v46 = vadd.f32 %v1212_v63, %v915_v42  ;;  %v933_v43 = vmul.f32 %v1214_v38, %v931_v51  ;;  %v1216_v2 = vpop.eup %1215  ;;  %vm938_vm0 = vweird.f32 %v1214_v38 }
 0x2d8   : > { %v901_v1 = vsel %vm900_vm11, %v1210_v57, %v897_v56  ;;  %vm939_vm2 = vmor %vm937_vm1, %vm938_vm0 }
 0x2d9   : > { %v906_v3 = vsel %vm903_vm13, %v905_v49, %v901_v1  ;;  %v920_v4 = vsel %vm919_vm12, %v1212_v63, %v916_v46  ;;  %v934_v5 = vsub.f32 1.0, %v933_v43 }
 0x2da   : > { %v925_v6 = vsel %vm922_vm14, %v924_v53, %v920_v4  ;;  %v948_v7 = vmul.f32 %v1216_v2, %v906_v3 }
 0x2db   : > { %v947_v9 = vmul.f32 %v925_v6, %v1854_v15  ;;  %v935_v10 = vmul.f32 %v1214_v38, %v934_v5 }
 0x2dd   : > { %v949_v11 = vadd.f32 %v948_v7, %v947_v9  ;;  %v936_v12 = vadd.f32 %v1214_v38, %v935_v10 }
 0x2df   : > { %1217 = vtanh.f32 %v949_v11  ;;  %v956_v13 = vsel %vm953_vm15, %v949_v11, %v1854_v15  ;;  %v940_v18 = vsel %vm939_vm2, %v1214_v38, %v936_v12 }
 0x2e0   : > { %957 = vst [vmem:[#allocation3] sm:$0xff] %v956_v13  ;;  %v945_v21 = vsel %vm942_vm3, %v944_v19, %v940_v18 }
 0x2e5   : > { %v1218_v20 = vpop.eup %1217 }
 0x2e6   : > { %v951_v22 = vmul.f32 %v1218_v20, %v945_v21 }
 0x2e8   : > { %v954_v23 = vsel %vm953_vm15, %v951_v22, %v1859_v24  ;;  %v958_v17 = vsel %vm953_vm15, %v951_v22, 0.0 }
 0x2e9   : > { %955 = vst [vmem:[#allocation2] sm:$0xff] %v954_v23 }
 0x2ea   : > { %1106 = vst [vmem:[%s1331_s10 + $0x18] sm:$0xff] %v958_v17 }
 0x2eb PF: > { %s13_s16 = sadd.s32 1, %s1257_s16   ;;  %s1992_s12 = smov %s1249_s14 }
 0x2ec   : > { %p10_p8 = scmp.ge.s32.totalorder %s13_s16, 8   ;;  %s1993_s13 = smov %s1253_s15 }
 0x2ed   : > { %s1994_s14 = smov %s1997_s17  ;;  %s1995_s15 = smov %s2001_s18 }
 0x2ee   :  { %12 = sbr.rel (!%p10_p8) target bundleno = 3 (0x3), region = 75 }

</bundles_post_ra>
